<compile_context>
chip_gen: v6e
topology: v6e:2x2x1
jax: 0.10.0
libtpu: 0.0.40
codegen_flags: <defaults>
</compile_context>

<pallas_src>
import jax
import jax.numpy as jnp
from jax.experimental import pallas as pl
from jax.experimental.pallas import tpu as pltpu

_ROW_ALIGN = 16  # bf16 sublane packing: keep row tiles multiples of 16


def dae_kernel(x_ref,
               w1_ref, b1_ref,
               w2_ref, b2_ref,
               w3_ref, b3_ref,
               w4_ref, b4_ref,
               out_ref):
    """Fused 4-layer MLP autoencoder forward for one batch tile.

    x_ref is f32 (cast to bf16 in-kernel), w*_ref are bf16 MXU operands,
    b*_ref are f32, out_ref is bf16. All accumulation / elementwise math is f32.
    """
    x = x_ref[...].astype(jnp.bfloat16)                               # (T, 128)

    # encoder: Linear -> ReLU -> (Dropout: identity) -> Linear -> ReLU
    h1 = jnp.dot(x, w1_ref[...], preferred_element_type=jnp.float32) + b1_ref[...]
    h1 = jnp.maximum(h1, 0.0).astype(jnp.bfloat16)
    h2 = jnp.dot(h1, w2_ref[...], preferred_element_type=jnp.float32) + b2_ref[...]
    h2 = jnp.maximum(h2, 0.0).astype(jnp.bfloat16)

    # decoder: Linear -> ReLU -> (Dropout: identity) -> Linear -> Sigmoid
    h3 = jnp.dot(h2, w3_ref[...], preferred_element_type=jnp.float32) + b3_ref[...]
    h3 = jnp.maximum(h3, 0.0).astype(jnp.bfloat16)
    z = jnp.dot(h3, w4_ref[...], preferred_element_type=jnp.float32) + b4_ref[...]

    # sigmoid(z) = 1 / (1 + exp(-z)); exp + approx reciprocal both on the EUP.
    sig = pl.reciprocal(1.0 + jnp.exp(-z), approx=True)
    out_ref[...] = sig.astype(out_ref.dtype)                          # bf16 out


def _round_up(x, m):
    return ((x + m - 1) // m) * m


def _prepare_params(params, lane=128):
    """Pad the 64-wide hidden layer to 128 lanes and cast weights to bf16."""
    w1, b1 = params["w1"], params["b1"]          # (D, 2H), (1, 2H)
    w2, b2 = params["w2"], params["b2"]          # (2H, H), (1, H)
    w3, b3 = params["w3"], params["b3"]          # (H, 2H), (1, 2H)
    w4, b4 = params["w4"], params["b4"]          # (2H, D), (1, D)

    h = w2.shape[1]
    hp = _round_up(h, lane)
    if hp != h:
        # zero-pad columns of w2/b2 and rows of w3 -> exact (padded lanes are 0)
        w2 = jnp.pad(w2, ((0, 0), (0, hp - h)))
        b2 = jnp.pad(b2, ((0, 0), (0, hp - h)))
        w3 = jnp.pad(w3, ((0, hp - h), (0, 0)))

    bf16 = jnp.bfloat16
    f32 = jnp.float32
    return (w1.astype(bf16), b1.astype(f32),
            w2.astype(bf16), b2.astype(f32),
            w3.astype(bf16), b3.astype(f32),
            w4.astype(bf16), b4.astype(f32))


def denoising_autoencoder(x, params, *, batch_tile=4096):
    """x: (B, input_dim) float32. params: dict of f32 weights/biases.

    Returns (B, input_dim) bfloat16 (upcast in the caller if f32 is needed).
    """
    B, D = x.shape
    w1, b1, w2, b2, w3, b3, w4, b4 = _prepare_params(params)

    # Row tile: as big as batch_tile allows, but never more than ceil(B/2)
    # (16-row aligned) so the 1-D grid has >= 2 steps whenever B > 16 — this
    # lets dimension_semantics=("parallel",) shard across v7x's two TCs.
    half = -(-B // 2)
    tile = max(_ROW_ALIGN,
               min(_round_up(batch_tile, _ROW_ALIGN), _round_up(half, _ROW_ALIGN)))
    n_tiles = pl.cdiv(B, tile)

    # VMEM budget: f32 x tile + bf16 out tile (double buffered), resident
    # weights, and headroom for f32 activation temporaries. Clamp to 32 MiB
    # (v7x physical VMEM is only 64 MiB).
    bytes_io = 2 * tile * D * 4 + 2 * tile * D * 2
    bytes_w = 2 * sum(int(a.size) * a.dtype.itemsize
                      for a in (w1, b1, w2, b2, w3, b3, w4, b4))
    bytes_act = 8 * tile * D * 4
    vmem_limit = min(max(bytes_io + bytes_w + bytes_act + (4 << 20), 16 << 20),
                     32 << 20)

    full = lambda arr: pl.BlockSpec(arr.shape, lambda i: (0, 0))

    return pl.pallas_call(
        dae_kernel,
        out_shape=jax.ShapeDtypeStruct((B, D), jnp.bfloat16),
        grid_spec=pltpu.PrefetchScalarGridSpec(
            num_scalar_prefetch=0,
            grid=(n_tiles,),
            in_specs=[
                pl.BlockSpec((tile, D), lambda i: (i, 0)),   # x tile (f32)
                full(w1), full(b1),
                full(w2), full(b2),
                full(w3), full(b3),
                full(w4), full(b4),
            ],
            out_specs=pl.BlockSpec((tile, D), lambda i: (i, 0)),  # bf16 out tile
        ),
        compiler_params=pltpu.CompilerParams(
            dimension_semantics=("parallel",),
            vmem_limit_bytes=vmem_limit,
        ),
    )(x, w1, b1, w2, b2, w3, b3, w4, b4)


def init_params(key, input_dim=128, hidden_dim=64):
    """Deterministic synthetic parameter init (matches PyTorch layer shapes)."""
    ks = jax.random.split(key, 8)

    def lin(kw, kb, fan_in, fan_out):
        bound = 1.0 / jnp.sqrt(fan_in)
        w = jax.random.uniform(kw, (fan_in, fan_out), jnp.float32, -bound, bound)
        b = jax.random.uniform(kb, (1, fan_out), jnp.float32, -bound, bound)
        return w, b

    w1, b1 = lin(ks[0], ks[1], input_dim, hidden_dim * 2)
    w2, b2 = lin(ks[2], ks[3], hidden_dim * 2, hidden_dim)
    w3, b3 = lin(ks[4], ks[5], hidden_dim, hidden_dim * 2)
    w4, b4 = lin(ks[6], ks[7], hidden_dim * 2, input_dim)
    return dict(w1=w1, b1=b1, w2=w2, b2=b2, w3=w3, b3=b3, w4=w4, b4=b4)


def reference_forward(x, p):
    """Pure-JAX f32 reference (un-padded, un-quantized)."""
    h1 = jnp.maximum(x @ p["w1"] + p["b1"], 0.0)
    h2 = jnp.maximum(h1 @ p["w2"] + p["b2"], 0.0)
    h3 = jnp.maximum(h2 @ p["w3"] + p["b3"], 0.0)
    return jax.nn.sigmoid(h3 @ p["w4"] + p["b4"])


if __name__ == "__main__":
    key = jax.random.PRNGKey(0)
    k_params, k_x = jax.random.split(key)

    input_dim, hidden_dim = 128, 64
    batch = 1000  # ragged (not a multiple of the tile) and yields a 2-step grid

    params = init_params(k_params, input_dim, hidden_dim)
    x = jax.random.uniform(k_x, (batch, input_dim), jnp.float32)  # spectrogram frames

    out = denoising_autoencoder(x, params)
    out = jax.block_until_ready(out)

    ref = reference_forward(x, params)
    assert out.shape == (batch, input_dim), out.shape
    # bf16 MXU operands + bf16 output -> relaxed tolerance vs the f32 reference
    out_f32 = out.astype(jnp.float32)
    assert jnp.allclose(out_f32, ref, atol=2e-2, rtol=2e-2), (
        "mismatch vs reference, max abs err = "
        f"{float(jnp.max(jnp.abs(out_f32 - ref)))}")

    print("KERNEL_OK")
</pallas_src>

<mosaic_0001>
module attributes {stable_mosaic.version = 11 : i64} {
  func.func @dae_kernel(%arg0: i32, %arg1: memref<512x128xf32, #tpu.memory_space<vmem>>, %arg2: memref<128x128xbf16, #tpu.memory_space<vmem>>, %arg3: memref<1x128xf32, #tpu.memory_space<vmem>>, %arg4: memref<128x128xbf16, #tpu.memory_space<vmem>>, %arg5: memref<1x128xf32, #tpu.memory_space<vmem>>, %arg6: memref<128x128xbf16, #tpu.memory_space<vmem>>, %arg7: memref<1x128xf32, #tpu.memory_space<vmem>>, %arg8: memref<128x128xbf16, #tpu.memory_space<vmem>>, %arg9: memref<1x128xf32, #tpu.memory_space<vmem>>, %arg10: memref<512x128xbf16, #tpu.memory_space<vmem>>) attributes {dimension_semantics = [#tpu.dimension_semantics<parallel>], iteration_bounds = array<i64: 2>, scalar_prefetch = 0 : i64, scratch_operands = 0 : i64, tpu.core_type = #tpu.core_type<tc>, window_params = [{transform_indices = @transform_0, window_bounds = array<i64: 512, 128>}, {pipeline_mode = #tpu.pipeline_mode<synchronous>, transform_indices = @transform_1, window_bounds = array<i64: 128, 128>}, {pipeline_mode = #tpu.pipeline_mode<synchronous>, transform_indices = @transform_2, window_bounds = array<i64: 1, 128>}, {pipeline_mode = #tpu.pipeline_mode<synchronous>, transform_indices = @transform_3, window_bounds = array<i64: 128, 128>}, {pipeline_mode = #tpu.pipeline_mode<synchronous>, transform_indices = @transform_4, window_bounds = array<i64: 1, 128>}, {pipeline_mode = #tpu.pipeline_mode<synchronous>, transform_indices = @transform_5, window_bounds = array<i64: 128, 128>}, {pipeline_mode = #tpu.pipeline_mode<synchronous>, transform_indices = @transform_6, window_bounds = array<i64: 1, 128>}, {pipeline_mode = #tpu.pipeline_mode<synchronous>, transform_indices = @transform_7, window_bounds = array<i64: 128, 128>}, {pipeline_mode = #tpu.pipeline_mode<synchronous>, transform_indices = @transform_8, window_bounds = array<i64: 1, 128>}, {transform_indices = @transform_9, window_bounds = array<i64: 512, 128>}]} {
    %c0 = arith.constant 0 : index
    %c0_0 = arith.constant 0 : index
    %0 = vector.load %arg1[%c0, %c0_0] : memref<512x128xf32, #tpu.memory_space<vmem>>, vector<512x128xf32>
    %1 = arith.truncf %0 : vector<512x128xf32> to vector<512x128xbf16>
    %c0_1 = arith.constant 0 : index
    %c0_2 = arith.constant 0 : index
    %2 = vector.load %arg2[%c0_1, %c0_2] : memref<128x128xbf16, #tpu.memory_space<vmem>>, vector<128x128xbf16>
    %cst = arith.constant dense<0.000000e+00> : vector<512x128xf32>
    %3 = tpu.matmul %1, %2, %cst {dimension_numbers = #tpu.dot_dimension_numbers<[1], [0], [0], [1], [0, 0, 1, 1], [], []>} : vector<512x128xbf16>, vector<128x128xbf16>, vector<512x128xf32> -> vector<512x128xf32>
    %c0_3 = arith.constant 0 : index
    %c0_4 = arith.constant 0 : index
    %4 = vector.load %arg3[%c0_3, %c0_4] : memref<1x128xf32, #tpu.memory_space<vmem>>, vector<1x128xf32>
    %5 = vector.broadcast %4 : vector<1x128xf32> to vector<512x128xf32>
    %6 = arith.addf %3, %5 : vector<512x128xf32>
    %cst_5 = arith.constant 0.000000e+00 : f32
    %7 = vector.broadcast %cst_5 : f32 to vector<512x128xf32>
    %8 = arith.maximumf %6, %7 : vector<512x128xf32>
    %9 = arith.truncf %8 : vector<512x128xf32> to vector<512x128xbf16>
    %c0_6 = arith.constant 0 : index
    %c0_7 = arith.constant 0 : index
    %10 = vector.load %arg4[%c0_6, %c0_7] : memref<128x128xbf16, #tpu.memory_space<vmem>>, vector<128x128xbf16>
    %cst_8 = arith.constant dense<0.000000e+00> : vector<512x128xf32>
    %11 = tpu.matmul %9, %10, %cst_8 {dimension_numbers = #tpu.dot_dimension_numbers<[1], [0], [0], [1], [0, 0, 1, 1], [], []>} : vector<512x128xbf16>, vector<128x128xbf16>, vector<512x128xf32> -> vector<512x128xf32>
    %c0_9 = arith.constant 0 : index
    %c0_10 = arith.constant 0 : index
    %12 = vector.load %arg5[%c0_9, %c0_10] : memref<1x128xf32, #tpu.memory_space<vmem>>, vector<1x128xf32>
    %13 = vector.broadcast %12 : vector<1x128xf32> to vector<512x128xf32>
    %14 = arith.addf %11, %13 : vector<512x128xf32>
    %cst_11 = arith.constant 0.000000e+00 : f32
    %15 = vector.broadcast %cst_11 : f32 to vector<512x128xf32>
    %16 = arith.maximumf %14, %15 : vector<512x128xf32>
    %17 = arith.truncf %16 : vector<512x128xf32> to vector<512x128xbf16>
    %c0_12 = arith.constant 0 : index
    %c0_13 = arith.constant 0 : index
    %18 = vector.load %arg6[%c0_12, %c0_13] : memref<128x128xbf16, #tpu.memory_space<vmem>>, vector<128x128xbf16>
    %cst_14 = arith.constant dense<0.000000e+00> : vector<512x128xf32>
    %19 = tpu.matmul %17, %18, %cst_14 {dimension_numbers = #tpu.dot_dimension_numbers<[1], [0], [0], [1], [0, 0, 1, 1], [], []>} : vector<512x128xbf16>, vector<128x128xbf16>, vector<512x128xf32> -> vector<512x128xf32>
    %c0_15 = arith.constant 0 : index
    %c0_16 = arith.constant 0 : index
    %20 = vector.load %arg7[%c0_15, %c0_16] : memref<1x128xf32, #tpu.memory_space<vmem>>, vector<1x128xf32>
    %21 = vector.broadcast %20 : vector<1x128xf32> to vector<512x128xf32>
    %22 = arith.addf %19, %21 : vector<512x128xf32>
    %cst_17 = arith.constant 0.000000e+00 : f32
    %23 = vector.broadcast %cst_17 : f32 to vector<512x128xf32>
    %24 = arith.maximumf %22, %23 : vector<512x128xf32>
    %25 = arith.truncf %24 : vector<512x128xf32> to vector<512x128xbf16>
    %c0_18 = arith.constant 0 : index
    %c0_19 = arith.constant 0 : index
    %26 = vector.load %arg8[%c0_18, %c0_19] : memref<128x128xbf16, #tpu.memory_space<vmem>>, vector<128x128xbf16>
    %cst_20 = arith.constant dense<0.000000e+00> : vector<512x128xf32>
    %27 = tpu.matmul %25, %26, %cst_20 {dimension_numbers = #tpu.dot_dimension_numbers<[1], [0], [0], [1], [0, 0, 1, 1], [], []>} : vector<512x128xbf16>, vector<128x128xbf16>, vector<512x128xf32> -> vector<512x128xf32>
    %c0_21 = arith.constant 0 : index
    %c0_22 = arith.constant 0 : index
    %28 = vector.load %arg9[%c0_21, %c0_22] : memref<1x128xf32, #tpu.memory_space<vmem>>, vector<1x128xf32>
    %29 = vector.broadcast %28 : vector<1x128xf32> to vector<512x128xf32>
    %30 = arith.addf %27, %29 : vector<512x128xf32>
    %cst_23 = arith.constant 0.000000e+00 : f32
    %31 = vector.broadcast %cst_23 : f32 to vector<512x128xf32>
    %32 = arith.subf %31, %30 : vector<512x128xf32>
    %33 = math.exp %32 : vector<512x128xf32>
    %cst_24 = arith.constant 1.000000e+00 : f32
    %34 = vector.broadcast %cst_24 : f32 to vector<512x128xf32>
    %35 = arith.addf %34, %33 : vector<512x128xf32>
    %36 = tpu.reciprocal %35 {approx = true} : vector<512x128xf32> -> vector<512x128xf32>
    %37 = arith.truncf %36 : vector<512x128xf32> to vector<512x128xbf16>
    %c0_25 = arith.constant 0 : index
    %c0_26 = arith.constant 0 : index
    %38 = vector.load %arg10[%c0_25, %c0_26] : memref<512x128xbf16, #tpu.memory_space<vmem>>, vector<512x128xbf16>
    tpu.vector_store %arg10[%c0_25, %c0_26], %37 {strides = array<i32>} : memref<512x128xbf16, #tpu.memory_space<vmem>>, vector<512x128xbf16>,
    return
  }
  func.func @transform_0(%arg0: i32) -> (i32, i32) {
    %c0_i32 = arith.constant 0 : i32
    %c0_i32_0 = arith.constant 0 : i32
    return %arg0, %c0_i32 : i32, i32
  }
  func.func @transform_1(%arg0: i32) -> (i32, i32) {
    %c0_i32 = arith.constant 0 : i32
    %c0_i32_0 = arith.constant 0 : i32
    %c0_i32_1 = arith.constant 0 : i32
    return %c0_i32, %c0_i32_0 : i32, i32
  }
  func.func @transform_2(%arg0: i32) -> (i32, i32) {
    %c0_i32 = arith.constant 0 : i32
    %c0_i32_0 = arith.constant 0 : i32
    %c0_i32_1 = arith.constant 0 : i32
    return %c0_i32, %c0_i32_0 : i32, i32
  }
  func.func @transform_3(%arg0: i32) -> (i32, i32) {
    %c0_i32 = arith.constant 0 : i32
    %c0_i32_0 = arith.constant 0 : i32
    %c0_i32_1 = arith.constant 0 : i32
    return %c0_i32, %c0_i32_0 : i32, i32
  }
  func.func @transform_4(%arg0: i32) -> (i32, i32) {
    %c0_i32 = arith.constant 0 : i32
    %c0_i32_0 = arith.constant 0 : i32
    %c0_i32_1 = arith.constant 0 : i32
    return %c0_i32, %c0_i32_0 : i32, i32
  }
  func.func @transform_5(%arg0: i32) -> (i32, i32) {
    %c0_i32 = arith.constant 0 : i32
    %c0_i32_0 = arith.constant 0 : i32
    %c0_i32_1 = arith.constant 0 : i32
    return %c0_i32, %c0_i32_0 : i32, i32
  }
  func.func @transform_6(%arg0: i32) -> (i32, i32) {
    %c0_i32 = arith.constant 0 : i32
    %c0_i32_0 = arith.constant 0 : i32
    %c0_i32_1 = arith.constant 0 : i32
    return %c0_i32, %c0_i32_0 : i32, i32
  }
  func.func @transform_7(%arg0: i32) -> (i32, i32) {
    %c0_i32 = arith.constant 0 : i32
    %c0_i32_0 = arith.constant 0 : i32
    %c0_i32_1 = arith.constant 0 : i32
    return %c0_i32, %c0_i32_0 : i32, i32
  }
  func.func @transform_8(%arg0: i32) -> (i32, i32) {
    %c0_i32 = arith.constant 0 : i32
    %c0_i32_0 = arith.constant 0 : i32
    %c0_i32_1 = arith.constant 0 : i32
    return %c0_i32, %c0_i32_0 : i32, i32
  }
  func.func @transform_9(%arg0: i32) -> (i32, i32) {
    %c0_i32 = arith.constant 0 : i32
    %c0_i32_0 = arith.constant 0 : i32
    return %arg0, %c0_i32 : i32, i32
  }
}

</mosaic_0001>

<bundles_post_ra>
// kernel: tpu_custom_call.1
= control target key start
LH: loop header
LB: loop body
LE: loop exit
PB: predicated region body
PF: predicated region fallthrough
CT: control target
= control target key end

     0   :  { %s5148_s0 = inlined_call_operand.hbm [shape: f32[1000,128], index: 0, kind: input, shape index: {}]   ;;  %s5149_s1 = inlined_call_operand.hbm [shape: bf16[128,128], index: 1, kind: input, shape index: {}]   ;;  %s5150_s2 = inlined_call_operand.vmem [shape: f32[1,128], index: 2, kind: input, shape index: {}]   ;;  %s5151_s3 = inlined_call_operand.hbm [shape: bf16[128,128], index: 3, kind: input, shape index: {}]   ;;  %s5152_s4 = inlined_call_operand.vmem [shape: f32[1,128], index: 4, kind: input, shape index: {}]   ;;  %s5153_s5 = inlined_call_operand.hbm [shape: bf16[128,128], index: 5, kind: input, shape index: {}]   ;;  %s5154_s6 = inlined_call_operand.vmem [shape: f32[1,128], index: 6, kind: input, shape index: {}]   ;;  %s5155_s7 = inlined_call_operand.hbm [shape: bf16[128,128], index: 7, kind: input, shape index: {}]   ;;  %s5156_s8 = inlined_call_operand.vmem [shape: f32[1,128], index: 8, kind: input, shape index: {}]   ;;  %s5157_s9 = inlined_call_operand.hbm [shape: bf16[1000,128], index: 9, kind: output, shape index: {}]  }
   0x1   :  { %5162 = sst [smem:[#allocation18_spill]] %s5149_s1 }
   0x2   :  { %5163 = sst [smem:[#allocation19_spill]] %s5151_s3 }
   0x3   :  { %14 = vsyncpa [#allocation3], 0 }
   0x4   :  { %16 = vsyncpa [#allocation3 + $0x1], 0 }
   0x5   :  { %17 = vsyncpa [#allocation6], 0 }
   0x6   :  { %18 = vsyncpa [#allocation9], 0 }
   0x7   :  { %19 = vsyncpa [#allocation4], 0 }
   0x8   :  { %21 = vsyncpa [#allocation4 + $0x1], 0  ;;  %s4529_s30 = smov 0   ;;  %s4531_s10 = smov 0  }
   0x9   :  { %s4533_s11 = smov 0   ;;  %s4535_s12 = smov 0  }
   0xa LB: > { %s4550_s13 = sadd.s32 4294967295, %s4465_s12   ;;  %s3021_s14 = sadd.s32 4294967294, %s4465_s12   ;;  %s4465_s12 = sphi %s4535_s12, %s5181_s12   ;;  %s4461_s11 = sphi %s4533_s11, %s5185_s11   ;;  %s4457_s10 = sphi %s4531_s10, %s5184_s10   ;;  %s4453_s30 = sphi %s4529_s30, %s5183_s30  }
   0xb   : > { %s4554_s15 = sadd.s32 1, %s4465_s12   ;;  %s34_s16 = sadd.s32 1, %s4461_s11 }
   0xc   : > { %5164 = sst [smem:[#allocation16_spill]] %s4554_s15  ;;  %s31_s17 = ssub.s32 %s4465_s12, %s4554_s15 }
   0xd   : > { %p41_p0 = scmp.ne.s32.totalorder %s4461_s11, %s4457_s10  ;;  %p32_p1 = scmp.eq.s32.totalorder %s31_s17, 0 }
   0xe   : > { %p42_p2 = scmp.eq.s32.totalorder %s4465_s12, 0  ;;  %p47_p3 = scmp.ne.s32.totalorder %s4457_s10, %s4453_s30 }
   0xf   : > { %p5160_p4 = scmp.eq.s32.totalorder %s4550_s13, 0  ;;  %p239_p7 = scmp.eq.s32.totalorder %s4550_s13, 1 }
  0x10   : > { %s4566_s18 = scalar_select %p32_p1, %s4461_s11, %s34_s16  }
  0x11   : > { %p4568_p5 = por %p42_p2, %p41_p0  ;;  %p4574_p6 = por %p5160_p4, %p47_p3 }
  0x12   : > { %5165 = sst [smem:[#allocation17_spill]] %s4566_s18  ;;  %p245_p8 = scmp.eq.s32.totalorder %s3021_s14, 1 }
  0x13   : > { %p3022_p9 = scmp.ge.s32.totalorder %s4465_s12, 1  ;;  %p252_p10 = scmp.lt.s32.totalorder %s4465_s12, 3 }
  0x14   : > { %p4581_p11 = por %p239_p7, %p41_p0  ;;  %p4585_p12 = por %p245_p8, %p47_p3 }
  0x15   : > { %p4589_p13 = pnand %p3022_p9, %p252_p10  ;;  %s4467_s24 = smov [#allocation5]  }
  0x16   : > { %s5168_s21 = scalar_select %p4581_p11, 1, 0 }
  0x17   : > { %s5169_s22 = scalar_select %p4585_p12, 1, 0 }
  0x18   : > { %p3906_p1 = pneg %p4589_p13  ;;  %s264_s25 = sshll.u32 %s4467_s24, 4  ;;  %s265_s25 = int_to_ptr.vmem [resolvable:$true] %s264_s25 }
  0x19   : > { %s4468_s27 = smov [#allocation8]   ;;  %s4274_s29 = scalar_lea.vmem %s265_s25, 1024 }
  0x1a   : > { %p4597_p2 = pnand %p3906_p1, %p5160_p4  ;;  %s296_s28 = sshll.u32 %s4468_s27, 4  ;;  %s297_s28 = int_to_ptr.vmem [resolvable:$true] %s296_s28 }
  0x1b   : > { %p4275_p3 = scmp.ne.s32.totalorder %s265_s25, %s4274_s29  ;;  %p4282_p9 = scmp.lt.s32.totalorder %s265_s25, %s265_s25 }
  0x1c   : > { %p4265_p0 = pneg %p4597_p2  ;;  %p4283_p10 = scmp.lt.s32.totalorder %s4274_s29, %s4274_s29 }
  0x1e   : > { %p4277_p7 = pnand %p4275_p3, %p4265_p0  ;;  %p4284_p12 = por %p4283_p10, %p4282_p9 }
  0x20   : > { %p4278_p8 = pneg %p4277_p7 }
  0x22   : > { %p4285_p1 = pnand %p4284_p12, %p4278_p8 }
  0x24   : > { %4288 = shalt.err (!%p4285_p1)
}
  0x25   : > { %s4469_s14 = smov 64   ;;  %s4470_s16 = smov 4  }
  0x26   : > { %s5172_s1 = sld [smem:[#allocation18_spill]]  ;;  %s4300_s27 = scalar_lea.vmem %s297_s28, 1024 }
  0x27   : > { %p4301_p3 = scmp.ne.s32.totalorder %s297_s28, %s4300_s27  ;;  %p4308_p12 = scmp.lt.s32.totalorder %s297_s28, %s297_s28 }
  0x28   : > { %p4309_p8 = scmp.lt.s32.totalorder %s4300_s27, %s4300_s27 }
  0x29   : > { %p4303_p7 = pnand %p4301_p3, %p4265_p0 }
  0x2a   : > { %p4310_p10 = por %p4309_p8, %p4308_p12 }
  0x2b   : > { %p4304_p9 = pneg %p4303_p7 }
  0x2c   : > { %3909 = dma.hbm_to_vmem [thread:$0]  (!%p4597_p2), %s5172_s1, 1024, %s265_s25, [#allocation6], %s4469_s14, %s4469_s14, %s4470_s16  }
  0x2d   : > { %p4311_p1 = pnand %p4310_p10, %p4304_p9 }
  0x2f   : > { %4314 = shalt.err (!%p4311_p1)
}
  0x30   : > { %3915 = dma.hbm_to_vmem [thread:$0]  (!%p4597_p2), %s5153_s5, 1024, %s297_s28, [#allocation9], %s4469_s14, %s4469_s14, %s4470_s16  }
  0x31   : > { %s4471_s25 = smov [#allocation7]   ;;  %s4472_s24 = smov [#allocation10]  }
  0x32   : > { %s280_s17 = sshll.u32 %s4471_s25, 4  ;;  %s312_s1 = sshll.u32 %s4472_s24, 4  ;;  %s281_s17 = int_to_ptr.vmem [resolvable:$true] %s280_s17  ;;  %s313_s1 = int_to_ptr.vmem [resolvable:$true] %s312_s1 }
  0x33   : > { %s4326_s15 = scalar_lea.vmem %s281_s17, 1024  ;;  %p4334_p12 = scmp.lt.s32.totalorder %s281_s17, %s281_s17 }
  0x34   : > { %p4327_p3 = scmp.ne.s32.totalorder %s281_s17, %s4326_s15  ;;  %p4335_p8 = scmp.lt.s32.totalorder %s4326_s15, %s4326_s15 }
  0x36   : > { %p4329_p7 = pnand %p4327_p3, %p4265_p0  ;;  %p4336_p10 = por %p4335_p8, %p4334_p12 }
  0x38   : > { %p4330_p9 = pneg %p4329_p7 }
  0x3a   : > { %p4337_p1 = pnand %p4336_p10, %p4330_p9 }
  0x3c   : > { %4340 = shalt.err (!%p4337_p1)
}
  0x3d   : > { %s5173_s3 = sld [smem:[#allocation19_spill]]  ;;  %s4352_s27 = scalar_lea.vmem %s313_s1, 1024 }
  0x3e   : > { %p4353_p4 = scmp.ne.s32.totalorder %s313_s1, %s4352_s27  ;;  %p4360_p12 = scmp.lt.s32.totalorder %s313_s1, %s313_s1 }
  0x3f   : > { %p4361_p9 = scmp.lt.s32.totalorder %s4352_s27, %s4352_s27 }
  0x40   : > { %p4355_p3 = pnand %p4353_p4, %p4265_p0 }
  0x41   : > { %p4362_p8 = por %p4361_p9, %p4360_p12 }
  0x42   : > { %p4356_p7 = pneg %p4355_p3 }
  0x43   : > { %3912 = dma.hbm_to_vmem [thread:$0]  (!%p4597_p2), %s5173_s3, 1024, %s281_s17, [#allocation6], %s4469_s14, %s4469_s14, %s4470_s16  }
  0x44   : > { %p4363_p10 = pnand %p4362_p8, %p4356_p7 }
  0x46   : > { %4366 = shalt.err (!%p4363_p10)
}
  0x47   : > { %3918 = dma.hbm_to_vmem [thread:$0]  (!%p4597_p2), %s5155_s7, 1024, %s313_s1, [#allocation9], %s4469_s14, %s4469_s14, %s4470_s16  }
  0x48   : > { %p5161_p1 = scmp.ge.s32.totalorder %s4465_s12, 2 }
  0x4a   : > { %325 = sbr.rel (%p5161_p1) target bundleno = 111 (0x6f), region = 48 }
  0x4f   : > { %328 = sbr.rel (!%p4568_p5) target bundleno = 111 (0x6f), region = 52  ;;  %s329_s25 = sand.u32 (%p4568_p5), 1, %s4461_s11  }
  0x50   : > { %s3029_s17 = sshll.u32 (%p4568_p5), %s4465_s12, 6  ;;  %s3028_s26 = sshll.u32 (%p4568_p5), %s329_s25, 9 }
  0x51   : > { %s335_s24 = ssub.s32 (%p4568_p5), 125, %s3029_s17  ;;  %s4657_s14 = scalar_lea.sflag (%p4568_p5), [#allocation3], %s329_s25 }
  0x52   : > { %p336_p4 = scmp.lt.s32.totalorder (%p4568_p5), %s335_s24, 64  ;;  %s333_s16 = scalar_lea.vmem (%p4568_p5), [#allocation2], %s3028_s26 }
  0x54   : > { %s5187_s24 = smov (!%p336_p4, %s335_s24), 64 }
  0x55   : > { %s4654_s18 = sshll.u32 %s5187_s24, 7 }
  0x56   : > { %s340_s1 = ssub.s32 8192, %s4654_s18 }
  0x57   : > { %341 = vsyncadd %s4657_s14, %s340_s1  ;;  %p3031_p5 = scmp.ne.s32.totalorder %s4654_s18, 0  ;;  %s3151_s19 = sshll.u32 %s4465_s12, 13 }
  0x58   : > { %s4665_s15 = scalar_lea.hbm %s5148_s0, %s3151_s19  ;;  %s346_s29 = sshll.u32 %s333_s16, 4  ;;  %s4667_s29 = int_to_ptr.vmem [resolvable:$true] %s346_s29 }
  0x59   : > { %s4367_s25 = scalar_lea.hbm %s4665_s15, %s4654_s18  ;;  %s4371_s24 = scalar_lea.hbm %s5148_s0, 16000 }
  0x5a   : > { %p4368_p2 = scmp.ne.s32.totalorder %s4665_s15, %s4367_s25  ;;  %p4372_p7 = scmp.lt.s32.totalorder %s4665_s15, %s5148_s0 }
  0x5b   : > { %p4373_p12 = scmp.lt.s32.totalorder %s4371_s24, %s4367_s25 }
  0x5c   : > { %p4369_p0 = pnand %p4368_p2, %p3031_p5 }
  0x5d   : > { %p4374_p9 = por %p4373_p12, %p4372_p7 }
  0x5e   : > { %p4370_p3 = pneg %p4369_p0 }
  0x60   : > { %p4375_p8 = pnand %p4374_p9, %p4370_p3 }
  0x62   : > { %4378 = shalt.err (!%p4375_p8)
}
  0x63   : > { %s4379_s16 = scalar_lea.vmem %s4667_s29, %s4654_s18  ;;  %s4473_s19 = smov [#allocation2]  }
  0x64   : > { %p4380_p10 = scmp.ne.s32.totalorder %s4667_s29, %s4379_s16  ;;  %s4383_s28 = sshll.u32 %s4473_s19, 4  ;;  %s4384_s28 = int_to_ptr.vmem [resolvable:$false] %s4383_s28 }
  0x65   : > { %s4385_s27 = scalar_lea.vmem %s4384_s28, 16384  ;;  %p4386_p0 = scmp.lt.s32.totalorder %s4667_s29, %s4384_s28 }
  0x66   : > { %p4381_p4 = pnand %p4380_p10, %p3031_p5  ;;  %p4387_p1 = scmp.lt.s32.totalorder %s4385_s27, %s4379_s16 }
  0x68   : > { %p4382_p2 = pneg %p4381_p4  ;;  %p4388_p11 = por %p4387_p1, %p4386_p0 }
  0x6a   : > { %p4389_p7 = pnand %p4388_p11, %p4382_p2 }
  0x6c   : > { %4392 = shalt.err (!%p4389_p7)
}
  0x6d   : > { %s4474_s3 = smov 128   ;;  %s4475_s25 = smov 8  }
  0x6e   : > { %352 = dma.hbm_to_vmem [thread:$0]  (%p3031_p5), %s4665_s15, %s4654_s18, %s4667_s29, %s4657_s14, %s4474_s3, %s4474_s3, %s4475_s25  }
  0x6f PF: > { %358 = sbr.rel (%p4589_p13) target bundleno = 1160 (0x488), region = 56  ;;  %s4696_s17 = sand.u32 (!%p4589_p13), 1, %s4457_s10  }
  0x70   : > { %s3036_s26 = sshll.u32 (!%p4589_p13), %s4696_s17, 9  ;;  %s361_s24 = scalar_lea.sflag (!%p4589_p13), [#allocation3], %s4696_s17 }
  0x71   : > { %s4700_s1 = scalar_lea.vmem (!%p4589_p13), [#allocation2], %s3036_s26 }
  0x74   : > { %4436 = dma.done.wait (%p4574_p6), %s361_s24, 8192  }
  0x75   : > { %4438 = vsyncadd (%p4574_p6), %s361_s24, 4294959104  ;;  %p5174_p11 = scmp.eq.s32.totalorder %s4550_s13, 0 }
  0x77   : > { %4440 = dma.done.wait (%p5174_p11), [#allocation6], 2048   ;;  %p5175_p13 = pmov %p5174_p11 }
  0x78   : > { %p5176_p1 = pmov %p5174_p11 }
  0x79   : > { %4442 = vsyncadd (%p5175_p13), [#allocation6], 4294965248 }
  0x7a   : > { %4444 = dma.done.wait (%p5176_p1), [#allocation9], 2048   ;;  %p5177_p5 = pmov %p5176_p1 }
  0x7b   : > { %v3974_v0 = vld [vmem:[#allocation5 + $0x38] sm:$0xff]   ;;  %v3975_v1 = vld [vmem:[#allocation5 + $0x30] sm:$0xff]   ;;  %v3976_v2 = vld [vmem:[#allocation5 + $0x28] sm:$0xff]   ;;  %s3041_s28 = sshll.u32 %s4696_s17, 8  ;;  %s2891_s26 = scalar_lea.sflag [#allocation4], %s4696_s17 }
  0x7c   : > { %4446 = vsyncadd (%p5177_p5), [#allocation9], 4294965248  ;;  %3568 = vmatprep.subr.bf16.mxu0 %v3974_v0  ;;  %v3977_v3 = vld [vmem:[#allocation5 + $0x20] sm:$0xff]   ;;  %v427_v5 = vld [vmem:[%s4700_s1 + $0x8] sm:$0xff]  ;;  %s5012_s27 = scalar_lea.vmem [#allocation11], %s3041_s28  ;;  %p5178_p6 = scmp.ne.s32.totalorder %s5168_s21, 0 }
  0x7d   : > { %3569 = vmatpush3.bf16.msra.mxu0 %v3974_v0  ;;  %v426_v4 = vld [vmem:[%s4700_s1] sm:$0xff]  ;;  %v3978_v7 = vld [vmem:[#allocation5 + $0x18] sm:$0xff]   ;;  %v3979_v8 = vld [vmem:[#allocation5 + $0x10] sm:$0xff]   ;;  %s3143_s24 = sshll.u32 (%p5178_p6), %s4550_s13, 6 }
  0x7e   : > { %3570 = vmatprep.subr.bf16.mxu0 %v3975_v1  ;;  %v490_v6 = vpack.c.bf16 %v427_v5, %v426_v4  ;;  %v3980_v9 = vld [vmem:[#allocation5 + $0x8] sm:$0xff]   ;;  %v3981_v10 = vld [vmem:[#allocation5] sm:$0xff]   ;;  %v428_v11 = vld [vmem:[%s4700_s1 + $0x10] sm:$0xff] }
  0x7f   : > { %v429_v12 = vld [vmem:[%s4700_s1 + $0x18] sm:$0xff]  ;;  %v430_v13 = vld [vmem:[%s4700_s1 + $0x20] sm:$0xff]  ;;  %v431_v14 = vld [vmem:[%s4700_s1 + $0x28] sm:$0xff] }
  0x80   : > { %3584 = vmatprep.mubr.bf16.mxu0 %v490_v6  ;;  %v491_v15 = vpack.c.bf16 %v429_v12, %v428_v11  ;;  %v3982_v16 = vld [vmem:[#allocation7 + $0x38] sm:$0xff]   ;;  %v492_v17 = vpack.c.bf16 %v431_v14, %v430_v13  ;;  %v3983_v18 = vld [vmem:[#allocation7 + $0x30] sm:$0xff]   ;;  %v434_v21 = vld [vmem:[%s4700_s1 + $0x40] sm:$0xff] }
  0x81   : > { %3571 = vmatpush3.bf16.msra.mxu0 %v3975_v1  ;;  %3648 = vmatprep.subr.bf16.mxu1 %v3982_v16  ;;  %v432_v19 = vld [vmem:[%s4700_s1 + $0x30] sm:$0xff]  ;;  %v433_v20 = vld [vmem:[%s4700_s1 + $0x38] sm:$0xff]  ;;  %v435_v22 = vld [vmem:[%s4700_s1 + $0x48] sm:$0xff] }
  0x82   : > { %3572 = vmatprep.subr.bf16.mxu0 %v3976_v2  ;;  %3649 = vmatpush3.bf16.msra.mxu1 %v3982_v16  ;;  %v3984_v23 = vld [vmem:[#allocation7 + $0x28] sm:$0xff]   ;;  %v3985_v24 = vld [vmem:[#allocation7 + $0x20] sm:$0xff]   ;;  %v493_v25 = vpack.c.bf16 %v433_v20, %v432_v19  ;;  %v494_v26 = vpack.c.bf16 %v435_v22, %v434_v21  ;;  %v3986_v27 = vld [vmem:[#allocation7 + $0x18] sm:$0xff]  }
  0x83   : > { %3650 = vmatprep.subr.bf16.mxu1 %v3983_v18  ;;  %v436_v28 = vld [vmem:[%s4700_s1 + $0x50] sm:$0xff]  ;;  %v437_v29 = vld [vmem:[%s4700_s1 + $0x58] sm:$0xff]  ;;  %v438_v30 = vld [vmem:[%s4700_s1 + $0x60] sm:$0xff] }
  0x84   : > { %v439_v31 = vld [vmem:[%s4700_s1 + $0x68] sm:$0xff]  ;;  %v495_v32 = vpack.c.bf16 %v437_v29, %v436_v28  ;;  %v440_v34 = vld [vmem:[%s4700_s1 + $0x70] sm:$0xff]  ;;  %v441_v35 = vld [vmem:[%s4700_s1 + $0x78] sm:$0xff] }
  0x85   : > { %3573 = vmatpush3.bf16.msra.mxu0 %v3976_v2  ;;  %v496_v33 = vpack.c.bf16 %v439_v31, %v438_v30  ;;  %v442_v36 = vld [vmem:[%s4700_s1 + $0x80] sm:$0xff]  ;;  %v443_v37 = vld [vmem:[%s4700_s1 + $0x88] sm:$0xff]  ;;  %v497_v38 = vpack.c.bf16 %v441_v35, %v440_v34  ;;  %v444_v40 = vld [vmem:[%s4700_s1 + $0x90] sm:$0xff] }
  0x86   : > { %3574 = vmatprep.subr.bf16.mxu0 %v3977_v3  ;;  %3651 = vmatpush3.bf16.msra.mxu1 %v3983_v18  ;;  %v498_v39 = vpack.c.bf16 %v443_v37, %v442_v36  ;;  %v445_v41 = vld [vmem:[%s4700_s1 + $0x98] sm:$0xff]  ;;  %v446_v42 = vld [vmem:[%s4700_s1 + $0xa0] sm:$0xff]  ;;  %v447_v43 = vld [vmem:[%s4700_s1 + $0xa8] sm:$0xff] }
  0x87   : > { %3652 = vmatprep.subr.bf16.mxu1 %v3984_v23  ;;  %v499_v44 = vpack.c.bf16 %v445_v41, %v444_v40  ;;  %v500_v45 = vpack.c.bf16 %v447_v43, %v446_v42  ;;  %v448_v46 = vld [vmem:[%s4700_s1 + $0xb0] sm:$0xff]  ;;  %v449_v47 = vld [vmem:[%s4700_s1 + $0xb8] sm:$0xff]  ;;  %v450_v48 = vld [vmem:[%s4700_s1 + $0xc0] sm:$0xff] }
  0x88   : > { %v451_v49 = vld [vmem:[%s4700_s1 + $0xc8] sm:$0xff]  ;;  %v501_v50 = vpack.c.bf16 %v449_v47, %v448_v46  ;;  %v452_v52 = vld [vmem:[%s4700_s1 + $0xd0] sm:$0xff]  ;;  %v453_v53 = vld [vmem:[%s4700_s1 + $0xd8] sm:$0xff] }
  0x89   : > { %3575 = vmatpush3.bf16.msra.mxu0 %v3977_v3  ;;  %v502_v51 = vpack.c.bf16 %v451_v49, %v450_v48  ;;  %v454_v54 = vld [vmem:[%s4700_s1 + $0xe0] sm:$0xff]  ;;  %v455_v55 = vld [vmem:[%s4700_s1 + $0xe8] sm:$0xff]  ;;  %v503_v56 = vpack.c.bf16 %v453_v53, %v452_v52  ;;  %v456_v58 = vld [vmem:[%s4700_s1 + $0xf0] sm:$0xff] }
  0x8a   : > { %3576 = vmatprep.subr.bf16.mxu0 %v3978_v7  ;;  %3653 = vmatpush3.bf16.msra.mxu1 %v3984_v23  ;;  %v504_v57 = vpack.c.bf16 %v455_v55, %v454_v54  ;;  %v457_v59 = vld [vmem:[%s4700_s1 + $0xf8] sm:$0xff]  ;;  %v458_v60 = vld [vmem:[%s4700_s1 + $0x100] sm:$0xff]  ;;  %v459_v61 = vld [vmem:[%s4700_s1 + $0x108] sm:$0xff] }
  0x8b   : > { %3654 = vmatprep.subr.bf16.mxu1 %v3985_v24  ;;  %v505_v62 = vpack.c.bf16 %v457_v59, %v456_v58  ;;  %v506_v63 = vpack.c.bf16 %v459_v61, %v458_v60  ;;  %v460_v0 = vld [vmem:[%s4700_s1 + $0x110] sm:$0xff]  ;;  %v461_v1 = vld [vmem:[%s4700_s1 + $0x118] sm:$0xff]  ;;  %v462_v2 = vld [vmem:[%s4700_s1 + $0x120] sm:$0xff] }
  0x8c   : > { %v463_v3 = vld [vmem:[%s4700_s1 + $0x128] sm:$0xff]  ;;  %v507_v4 = vpack.c.bf16 %v461_v1, %v460_v0  ;;  %v3987_v6 = vld [vmem:[#allocation7 + $0x10] sm:$0xff]   ;;  %v3989_v14 = vld [vmem:[#allocation7] sm:$0xff]  }
  0x8d   : > { %3577 = vmatpush3.bf16.msra.mxu0 %v3978_v7  ;;  %v508_v5 = vpack.c.bf16 %v463_v3, %v462_v2  ;;  %v464_v7 = vld [vmem:[%s4700_s1 + $0x130] sm:$0xff]  ;;  %v3988_v12 = vld [vmem:[#allocation7 + $0x8] sm:$0xff]   ;;  %v469_v16 = vld [vmem:[%s4700_s1 + $0x158] sm:$0xff] }
  0x8e   : > { %3578 = vmatprep.subr.bf16.mxu0 %v3979_v8  ;;  %3655 = vmatpush3.bf16.msra.mxu1 %v3985_v24  ;;  %v471_v18 = vld [vmem:[%s4700_s1 + $0x168] sm:$0xff]  ;;  %v472_v21 = vld [vmem:[%s4700_s1 + $0x170] sm:$0xff]  ;;  %v473_v22 = vld [vmem:[%s4700_s1 + $0x178] sm:$0xff] }
  0x8f   : > { %3656 = vmatprep.subr.bf16.mxu1 %v3986_v27  ;;  %v474_v23 = vld [vmem:[%s4700_s1 + $0x180] sm:$0xff]  ;;  %v475_v24 = vld [vmem:[%s4700_s1 + $0x188] sm:$0xff]  ;;  %v477_v28 = vld [vmem:[%s4700_s1 + $0x198] sm:$0xff] }
  0x90   : > { %v478_v29 = vld [vmem:[%s4700_s1 + $0x1a0] sm:$0xff]  ;;  %v479_v30 = vld [vmem:[%s4700_s1 + $0x1a8] sm:$0xff]  ;;  %v481_v34 = vld [vmem:[%s4700_s1 + $0x1b8] sm:$0xff] }
  0x91   : > { %3579 = vmatpush3.bf16.msra.mxu0 %v3979_v8  ;;  %v465_v8 = vld [vmem:[%s4700_s1 + $0x138] sm:$0xff]  ;;  %v482_v35 = vld [vmem:[%s4700_s1 + $0x1c0] sm:$0xff]  ;;  %v483_v36 = vld [vmem:[%s4700_s1 + $0x1c8] sm:$0xff] }
  0x92   : > { %3580 = vmatprep.subr.bf16.mxu0 %v3980_v9  ;;  %3657 = vmatpush3.bf16.msra.mxu1 %v3986_v27  ;;  %v509_v11 = vpack.c.bf16 %v465_v8, %v464_v7  ;;  %v476_v27 = vld [vmem:[%s4700_s1 + $0x190] sm:$0xff]  ;;  %v485_v40 = vld [vmem:[%s4700_s1 + $0x1d8] sm:$0xff]  ;;  %v486_v41 = vld [vmem:[%s4700_s1 + $0x1e0] sm:$0xff] }
  0x93   : > { %3658 = vmatprep.subr.bf16.mxu1 %v3987_v6  ;;  %v515_v31 = vpack.c.bf16 %v477_v28, %v476_v27  ;;  %v487_v42 = vld [vmem:[%s4700_s1 + $0x1e8] sm:$0xff]  ;;  %v489_v46 = vld [vmem:[%s4700_s1 + $0x1f8] sm:$0xff]  ;;  %v3991_v49 = vld [vmem:[#allocation8 + $0x30] sm:$0xff]  }
  0x94   : > { %v3990_v48 = vld [vmem:[#allocation8 + $0x38] sm:$0xff]   ;;  %v4781_v53 = vld [vmem:[%s5150_s2] ss:$0 sm:$0xff] }
  0x95   : > { %3581 = vmatpush3.bf16.msra.mxu0 %v3980_v9  ;;  %v466_v9 = vld [vmem:[%s4700_s1 + $0x140] sm:$0xff]  ;;  %v3994_v60 = vld [vmem:[#allocation8 + $0x18] sm:$0xff]  }
  0x96   : > { %3582 = vmatprep.subr.bf16.mxu0 %v3981_v10  ;;  %3659 = vmatpush3.bf16.msra.mxu1 %v3987_v6  ;;  %v3993_v59 = vld [vmem:[#allocation8 + $0x20] sm:$0xff]  }
  0x97   : > { %3660 = vmatprep.subr.bf16.mxu1 %v3988_v12 }
  0x99   : > { %3583 = vmatpush3.bf16.msra.mxu0 %v3981_v10  ;;  %v467_v10 = vld [vmem:[%s4700_s1 + $0x148] sm:$0xff] }
  0x9a   : > { %v510_v13 = vpack.c.bf16 %v467_v10, %v466_v9  ;;  %3661 = vmatpush3.bf16.msra.mxu1 %v3988_v12  ;;  %3728 = vmatprep.subr.bf16.mxu0 %v3990_v48  ;;  %v3996_v12 = vld [vmem:[#allocation8 + $0x8] sm:$0xff]  }
  0x9b   : > { %3662 = vmatprep.subr.bf16.mxu1 %v3989_v14 }
  0x9c   : > { %3585 = vmatmul.mubr.bf16.vlgmr.msra.gmra.mxu0 %v491_v15  ;;  %v468_v15 = vld [vmem:[%s4700_s1 + $0x150] sm:$0xff] }
  0x9d   : > { %3588 = vmatprep.mubr.bf16.mxu0 %v492_v17  ;;  %v470_v17 = vld [vmem:[%s4700_s1 + $0x160] sm:$0xff]  ;;  %v511_v19 = vpack.c.bf16 %v469_v16, %v468_v15  ;;  %3729 = vmatpush3.bf16.msra.mxu0 %v3990_v48 }
  0x9e   : > { %3663 = vmatpush3.bf16.msra.mxu1 %v3989_v14  ;;  %v512_v20 = vpack.c.bf16 %v471_v18, %v470_v17  ;;  %3730 = vmatprep.subr.bf16.mxu0 %v3991_v49 }
  0xa1   : > { %3731 = vmatpush3.bf16.msra.mxu0 %v3991_v49 }
  0xa4   : > { %3589 = vmatmul.mubr.bf16.gmra.mxu0 %v493_v25  ;;  %v513_v25 = vpack.c.bf16 %v473_v22, %v472_v21 }
  0xa5   : > { %3592 = vmatprep.mubr.bf16.mxu0 %v494_v26  ;;  %v514_v26 = vpack.c.bf16 %v475_v24, %v474_v23 }
  0xac   : > { %3593 = vmatmul.mubr.bf16.gmra.mxu0 %v495_v32  ;;  %v516_v32 = vpack.c.bf16 %v479_v30, %v478_v29 }
  0xad   : > { %3596 = vmatprep.mubr.bf16.mxu0 %v496_v33  ;;  %v480_v33 = vld [vmem:[%s4700_s1 + $0x1b0] sm:$0xff] }
  0xae   : > { %v517_v37 = vpack.c.bf16 %v481_v34, %v480_v33 }
  0xb4   : > { %3597 = vmatmul.mubr.bf16.gmra.mxu0 %v497_v38  ;;  %v518_v38 = vpack.c.bf16 %v483_v36, %v482_v35 }
  0xb5   : > { %3600 = vmatprep.mubr.bf16.mxu0 %v498_v39  ;;  %v484_v39 = vld [vmem:[%s4700_s1 + $0x1d0] sm:$0xff] }
  0xb6   : > { %v519_v43 = vpack.c.bf16 %v485_v40, %v484_v39 }
  0xbc   : > { %3601 = vmatmul.mubr.bf16.gmra.mxu0 %v499_v44  ;;  %v520_v44 = vpack.c.bf16 %v487_v42, %v486_v41 }
  0xbd   : > { %3604 = vmatprep.mubr.bf16.mxu0 %v500_v45  ;;  %v488_v45 = vld [vmem:[%s4700_s1 + $0x1f0] sm:$0xff]  ;;  %s2899_s1 = ssub.s32 (%p5178_p6), 125, %s3143_s24 }
  0xbe   : > { %v521_v47 = vpack.c.bf16 %v489_v46, %v488_v45  ;;  %p2900_p3 = scmp.lt.s32.totalorder (%p5178_p6), %s2899_s1, 64 }
  0xc4   : > { %3605 = vmatmul.mubr.bf16.gmra.mxu0 %v501_v50  ;;  %v3992_v50 = vld [vmem:[#allocation8 + $0x28] sm:$0xff]  }
  0xc5   : > { %3608 = vmatprep.mubr.bf16.mxu0 %v502_v51  ;;  %3732 = vmatprep.subr.bf16.mxu0 %v3992_v50 }
  0xc6   : > { %3733 = vmatpush3.bf16.msra.mxu0 %v3992_v50 }
  0xc7   : > { %3734 = vmatprep.subr.bf16.mxu0 %v3993_v59 }
  0xca   : > { %3735 = vmatpush3.bf16.msra.mxu0 %v3993_v59 }
  0xcb   : > { %3736 = vmatprep.subr.bf16.mxu0 %v3994_v60 }
  0xcc   : > { %3609 = vmatmul.mubr.bf16.gmra.mxu0 %v503_v56 }
  0xcd   : > { %3612 = vmatprep.mubr.bf16.mxu0 %v504_v57 }
  0xce   : > { %3737 = vmatpush3.bf16.msra.mxu0 %v3994_v60 }
  0xd4   : > { %3613 = vmatmul.mubr.bf16.gmra.mxu0 %v505_v62 }
  0xd5   : > { %3616 = vmatprep.mubr.bf16.mxu0 %v506_v63 }
  0xdc   : > { %3617 = vmatmul.mubr.bf16.gmra.mxu0 %v507_v4  ;;  %v3995_v4 = vld [vmem:[#allocation8 + $0x10] sm:$0xff]  }
  0xdd   : > { %3620 = vmatprep.mubr.bf16.mxu0 %v508_v5  ;;  %3738 = vmatprep.subr.bf16.mxu0 %v3995_v4 }
  0xde   : > { %3739 = vmatpush3.bf16.msra.mxu0 %v3995_v4 }
  0xdf   : > { %3740 = vmatprep.subr.bf16.mxu0 %v3996_v12 }
  0xe2   : > { %3741 = vmatpush3.bf16.msra.mxu0 %v3996_v12 }
  0xe4   : > { %3621 = vmatmul.mubr.bf16.gmra.mxu0 %v509_v11 }
  0xe5   : > { %3624 = vmatprep.mubr.bf16.mxu0 %v510_v13 }
  0xec   : > { %3625 = vmatmul.mubr.bf16.gmra.mxu0 %v511_v19 }
  0xed   : > { %3628 = vmatprep.mubr.bf16.mxu0 %v512_v20  ;;  %v3997_v20 = vld [vmem:[#allocation8] sm:$0xff]  }
  0xee   : > { %3742 = vmatprep.subr.bf16.mxu0 %v3997_v20 }
  0xef   : > { %3743 = vmatpush3.bf16.msra.mxu0 %v3997_v20 }
  0xf4   : > { %3629 = vmatmul.mubr.bf16.gmra.mxu0 %v513_v25 }
  0xf5   : > { %3632 = vmatprep.mubr.bf16.mxu0 %v514_v26 }
  0xfc   : > { %3633 = vmatmul.mubr.bf16.gmra.mxu0 %v515_v31 }
  0xfd   : > { %3636 = vmatprep.mubr.bf16.mxu0 %v516_v32 }
 0x104   : > { %3637 = vmatmul.mubr.bf16.gmra.mxu0 %v517_v37 }
 0x105   : > { %3640 = vmatprep.mubr.bf16.mxu0 %v518_v38 }
 0x10c   : > { %3641 = vmatmul.mubr.bf16.gmra.mxu0 %v519_v43 }
 0x10d   : > { %3644 = vmatprep.mubr.bf16.mxu0 %v520_v44 }
 0x114   : > { %3645 = vmatmul.mubr.bf16.gmra.mxu0 %v521_v47 }
 0x15c   : > { %v3586_v51 = vpop.f32.mrf.mxu0 }
 0x15d   : > { %v636_v57 = vadd.f32 %v3586_v51, %v4781_v53 }
 0x15e   : > { %v627_v52 = vpop.f32.mrf.mxu0 }
 0x15f   : > { %v628_v55 = vadd.f32 %v4781_v53, %v627_v52  ;;  %v884_v2 = vmax.f32 %v636_v57, 0.0 }
 0x160   : > { %v3587_v54 = vpop.f32.mrf.mxu0 }
 0x161   : > { %v639_v56 = vadd.f32 %v3587_v54, %v4781_v53  ;;  %v882_v0 = vmax.f32 %v628_v55, 0.0 }
 0x162   : > { %v630_v58 = vpop.f32.mrf.mxu0 }
 0x163   : > { %v631_v61 = vadd.f32 %v4781_v53, %v630_v58  ;;  %v885_v62 = vmax.f32 %v639_v56, 0.0 }
 0x164   : > { %v3590_v63 = vpop.f32.mrf.mxu0 }
 0x165   : > { %v883_v1 = vmax.f32 %v631_v61, 0.0  ;;  %v947_v6 = vpack.c.bf16 %v885_v62, %v884_v2  ;;  %v652_v10 = vadd.f32 %v3590_v63, %v4781_v53 }
 0x166   : > { %v643_v3 = vpop.f32.mrf.mxu0 }
 0x167   : > { %v946_v5 = vpack.c.bf16 %v883_v1, %v882_v0  ;;  %v644_v8 = vadd.f32 %v4781_v53, %v643_v3  ;;  %v888_v18 = vmax.f32 %v652_v10, 0.0 }
 0x168   : > { %v3591_v7 = vpop.f32.mrf.mxu0 }
 0x169   : > { %v655_v9 = vadd.f32 %v3591_v7, %v4781_v53  ;;  %3664 = vmatprep.mubr.bf16.mxu1 %v946_v5  ;;  %v886_v16 = vmax.f32 %v644_v8, 0.0 }
 0x16a   : > { %v646_v11 = vpop.f32.mrf.mxu0  ;;  %3665 = vmatmul.mubr.bf16.vlgmr.msra.gmra.mxu1 %v947_v6 }
 0x16b   : > { %v647_v13 = vadd.f32 %v4781_v53, %v646_v11  ;;  %v889_v14 = vmax.f32 %v655_v9, 0.0 }
 0x16c   : > { %v3594_v15 = vpop.f32.mrf.mxu0 }
 0x16d   : > { %v887_v17 = vmax.f32 %v647_v13, 0.0  ;;  %v949_v22 = vpack.c.bf16 %v889_v14, %v888_v18  ;;  %v668_v26 = vadd.f32 %v3594_v15, %v4781_v53 }
 0x16e   : > { %v659_v19 = vpop.f32.mrf.mxu0 }
 0x16f   : > { %v948_v21 = vpack.c.bf16 %v887_v17, %v886_v16  ;;  %v660_v24 = vadd.f32 %v4781_v53, %v659_v19  ;;  %v892_v33 = vmax.f32 %v668_v26, 0.0 }
 0x170   : > { %v3595_v23 = vpop.f32.mrf.mxu0 }
 0x171   : > { %v671_v25 = vadd.f32 %v3595_v23, %v4781_v53  ;;  %3668 = vmatprep.mubr.bf16.mxu1 %v948_v21  ;;  %v890_v31 = vmax.f32 %v660_v24, 0.0 }
 0x172   : > { %v662_v27 = vpop.f32.mrf.mxu0  ;;  %3669 = vmatmul.mubr.bf16.gmra.mxu1 %v949_v22 }
 0x173   : > { %v663_v28 = vadd.f32 %v4781_v53, %v662_v27  ;;  %v893_v29 = vmax.f32 %v671_v25, 0.0 }
 0x174   : > { %v3598_v30 = vpop.f32.mrf.mxu0 }
 0x175   : > { %v891_v32 = vmax.f32 %v663_v28, 0.0  ;;  %v951_v36 = vpack.c.bf16 %v893_v29, %v892_v33  ;;  %v684_v40 = vadd.f32 %v3598_v30, %v4781_v53 }
 0x176   : > { %v675_v34 = vpop.f32.mrf.mxu0 }
 0x177   : > { %v950_v35 = vpack.c.bf16 %v891_v32, %v890_v31  ;;  %v676_v38 = vadd.f32 %v4781_v53, %v675_v34  ;;  %v896_v47 = vmax.f32 %v684_v40, 0.0 }
 0x178   : > { %v3599_v37 = vpop.f32.mrf.mxu0 }
 0x179   : > { %v687_v39 = vadd.f32 %v3599_v37, %v4781_v53  ;;  %3672 = vmatprep.mubr.bf16.mxu1 %v950_v35  ;;  %v894_v45 = vmax.f32 %v676_v38, 0.0 }
 0x17a   : > { %v678_v41 = vpop.f32.mrf.mxu0  ;;  %3673 = vmatmul.mubr.bf16.gmra.mxu1 %v951_v36 }
 0x17b   : > { %v679_v42 = vadd.f32 %v4781_v53, %v678_v41  ;;  %v897_v43 = vmax.f32 %v687_v39, 0.0 }
 0x17c   : > { %v3602_v44 = vpop.f32.mrf.mxu0 }
 0x17d   : > { %v895_v46 = vmax.f32 %v679_v42, 0.0  ;;  %v953_v50 = vpack.c.bf16 %v897_v43, %v896_v47  ;;  %v700_v55 = vadd.f32 %v3602_v44, %v4781_v53 }
 0x17e   : > { %v691_v48 = vpop.f32.mrf.mxu0 }
 0x17f   : > { %v952_v49 = vpack.c.bf16 %v895_v46, %v894_v45  ;;  %v692_v52 = vadd.f32 %v4781_v53, %v691_v48  ;;  %v900_v62 = vmax.f32 %v700_v55, 0.0 }
 0x180   : > { %v3603_v51 = vpop.f32.mrf.mxu0 }
 0x181   : > { %v703_v54 = vadd.f32 %v3603_v51, %v4781_v53  ;;  %3676 = vmatprep.mubr.bf16.mxu1 %v952_v49  ;;  %v898_v60 = vmax.f32 %v692_v52, 0.0 }
 0x182   : > { %v694_v56 = vpop.f32.mrf.mxu0  ;;  %3677 = vmatmul.mubr.bf16.gmra.mxu1 %v953_v50 }
 0x183   : > { %v695_v57 = vadd.f32 %v4781_v53, %v694_v56  ;;  %v901_v58 = vmax.f32 %v703_v54, 0.0 }
 0x184   : > { %v3606_v59 = vpop.f32.mrf.mxu0 }
 0x185   : > { %v899_v61 = vmax.f32 %v695_v57, 0.0  ;;  %v955_v1 = vpack.c.bf16 %v901_v58, %v900_v62  ;;  %v716_v5 = vadd.f32 %v3606_v59, %v4781_v53 }
 0x186   : > { %v707_v63 = vpop.f32.mrf.mxu0 }
 0x187   : > { %v954_v0 = vpack.c.bf16 %v899_v61, %v898_v60  ;;  %v708_v3 = vadd.f32 %v4781_v53, %v707_v63  ;;  %v904_v12 = vmax.f32 %v716_v5, 0.0 }
 0x188   : > { %v3607_v2 = vpop.f32.mrf.mxu0 }
 0x189   : > { %v719_v4 = vadd.f32 %v3607_v2, %v4781_v53  ;;  %3680 = vmatprep.mubr.bf16.mxu1 %v954_v0  ;;  %v902_v10 = vmax.f32 %v708_v3, 0.0 }
 0x18a   : > { %v710_v6 = vpop.f32.mrf.mxu0  ;;  %3681 = vmatmul.mubr.bf16.gmra.mxu1 %v955_v1 }
 0x18b   : > { %v711_v7 = vadd.f32 %v4781_v53, %v710_v6  ;;  %v905_v8 = vmax.f32 %v719_v4, 0.0 }
 0x18c   : > { %v3610_v9 = vpop.f32.mrf.mxu0 }
 0x18d   : > { %v903_v11 = vmax.f32 %v711_v7, 0.0  ;;  %v957_v15 = vpack.c.bf16 %v905_v8, %v904_v12  ;;  %v732_v19 = vadd.f32 %v3610_v9, %v4781_v53 }
 0x18e   : > { %v723_v13 = vpop.f32.mrf.mxu0 }
 0x18f   : > { %v956_v14 = vpack.c.bf16 %v903_v11, %v902_v10  ;;  %v724_v17 = vadd.f32 %v4781_v53, %v723_v13  ;;  %v908_v26 = vmax.f32 %v732_v19, 0.0 }
 0x190   : > { %v3611_v16 = vpop.f32.mrf.mxu0 }
 0x191   : > { %v735_v18 = vadd.f32 %v3611_v16, %v4781_v53  ;;  %3684 = vmatprep.mubr.bf16.mxu1 %v956_v14  ;;  %v906_v24 = vmax.f32 %v724_v17, 0.0 }
 0x192   : > { %v726_v20 = vpop.f32.mrf.mxu0  ;;  %3685 = vmatmul.mubr.bf16.gmra.mxu1 %v957_v15 }
 0x193   : > { %v727_v21 = vadd.f32 %v4781_v53, %v726_v20  ;;  %v909_v22 = vmax.f32 %v735_v18, 0.0 }
 0x194   : > { %v3614_v23 = vpop.f32.mrf.mxu0 }
 0x195   : > { %v907_v25 = vmax.f32 %v727_v21, 0.0  ;;  %v959_v29 = vpack.c.bf16 %v909_v22, %v908_v26  ;;  %v748_v33 = vadd.f32 %v3614_v23, %v4781_v53 }
 0x196   : > { %v739_v27 = vpop.f32.mrf.mxu0 }
 0x197   : > { %v958_v28 = vpack.c.bf16 %v907_v25, %v906_v24  ;;  %v740_v31 = vadd.f32 %v4781_v53, %v739_v27  ;;  %v912_v40 = vmax.f32 %v748_v33, 0.0 }
 0x198   : > { %v3615_v30 = vpop.f32.mrf.mxu0 }
 0x199   : > { %v751_v32 = vadd.f32 %v3615_v30, %v4781_v53  ;;  %3688 = vmatprep.mubr.bf16.mxu1 %v958_v28  ;;  %v910_v38 = vmax.f32 %v740_v31, 0.0 }
 0x19a   : > { %v742_v34 = vpop.f32.mrf.mxu0  ;;  %3689 = vmatmul.mubr.bf16.gmra.mxu1 %v959_v29 }
 0x19b   : > { %v743_v35 = vadd.f32 %v4781_v53, %v742_v34  ;;  %v913_v36 = vmax.f32 %v751_v32, 0.0 }
 0x19c   : > { %v3618_v37 = vpop.f32.mrf.mxu0 }
 0x19d   : > { %v911_v39 = vmax.f32 %v743_v35, 0.0  ;;  %v961_v43 = vpack.c.bf16 %v913_v36, %v912_v40  ;;  %v764_v47 = vadd.f32 %v3618_v37, %v4781_v53 }
 0x19e   : > { %v755_v41 = vpop.f32.mrf.mxu0 }
 0x19f   : > { %v960_v42 = vpack.c.bf16 %v911_v39, %v910_v38  ;;  %v756_v45 = vadd.f32 %v4781_v53, %v755_v41  ;;  %v916_v55 = vmax.f32 %v764_v47, 0.0 }
 0x1a0   : > { %v3619_v44 = vpop.f32.mrf.mxu0 }
 0x1a1   : > { %v767_v46 = vadd.f32 %v3619_v44, %v4781_v53  ;;  %3692 = vmatprep.mubr.bf16.mxu1 %v960_v42  ;;  %v914_v52 = vmax.f32 %v756_v45, 0.0 }
 0x1a2   : > { %v758_v48 = vpop.f32.mrf.mxu0  ;;  %3693 = vmatmul.mubr.bf16.gmra.mxu1 %v961_v43 }
 0x1a3   : > { %v759_v49 = vadd.f32 %v4781_v53, %v758_v48  ;;  %v917_v50 = vmax.f32 %v767_v46, 0.0 }
 0x1a4   : > { %v3622_v51 = vpop.f32.mrf.mxu0 }
 0x1a5   : > { %v915_v54 = vmax.f32 %v759_v49, 0.0  ;;  %v963_v58 = vpack.c.bf16 %v917_v50, %v916_v55  ;;  %v780_v62 = vadd.f32 %v3622_v51, %v4781_v53 }
 0x1a6   : > { %v771_v56 = vpop.f32.mrf.mxu0 }
 0x1a7   : > { %v962_v57 = vpack.c.bf16 %v915_v54, %v914_v52  ;;  %v772_v60 = vadd.f32 %v4781_v53, %v771_v56  ;;  %v920_v5 = vmax.f32 %v780_v62, 0.0 }
 0x1a8   : > { %v3623_v59 = vpop.f32.mrf.mxu0 }
 0x1a9   : > { %v783_v61 = vadd.f32 %v3623_v59, %v4781_v53  ;;  %3696 = vmatprep.mubr.bf16.mxu1 %v962_v57  ;;  %v918_v3 = vmax.f32 %v772_v60, 0.0 }
 0x1aa   : > { %v774_v63 = vpop.f32.mrf.mxu0  ;;  %3697 = vmatmul.mubr.bf16.gmra.mxu1 %v963_v58 }
 0x1ab   : > { %v775_v0 = vadd.f32 %v4781_v53, %v774_v63  ;;  %v921_v1 = vmax.f32 %v783_v61, 0.0 }
 0x1ac   : > { %v3626_v2 = vpop.f32.mrf.mxu0 }
 0x1ad   : > { %v919_v4 = vmax.f32 %v775_v0, 0.0  ;;  %v965_v8 = vpack.c.bf16 %v921_v1, %v920_v5  ;;  %v796_v12 = vadd.f32 %v3626_v2, %v4781_v53 }
 0x1ae   : > { %v787_v6 = vpop.f32.mrf.mxu0 }
 0x1af   : > { %v964_v7 = vpack.c.bf16 %v919_v4, %v918_v3  ;;  %v788_v10 = vadd.f32 %v4781_v53, %v787_v6  ;;  %v924_v19 = vmax.f32 %v796_v12, 0.0 }
 0x1b0   : > { %v3627_v9 = vpop.f32.mrf.mxu0 }
 0x1b1   : > { %v799_v11 = vadd.f32 %v3627_v9, %v4781_v53  ;;  %3700 = vmatprep.mubr.bf16.mxu1 %v964_v7  ;;  %v922_v17 = vmax.f32 %v788_v10, 0.0 }
 0x1b2   : > { %v790_v13 = vpop.f32.mrf.mxu0  ;;  %3701 = vmatmul.mubr.bf16.gmra.mxu1 %v965_v8 }
 0x1b3   : > { %v791_v14 = vadd.f32 %v4781_v53, %v790_v13  ;;  %v925_v15 = vmax.f32 %v799_v11, 0.0 }
 0x1b4   : > { %v3630_v16 = vpop.f32.mrf.mxu0 }
 0x1b5   : > { %v923_v18 = vmax.f32 %v791_v14, 0.0  ;;  %v967_v22 = vpack.c.bf16 %v925_v15, %v924_v19  ;;  %v812_v26 = vadd.f32 %v3630_v16, %v4781_v53 }
 0x1b6   : > { %v803_v20 = vpop.f32.mrf.mxu0 }
 0x1b7   : > { %v966_v21 = vpack.c.bf16 %v923_v18, %v922_v17  ;;  %v804_v24 = vadd.f32 %v4781_v53, %v803_v20  ;;  %v928_v33 = vmax.f32 %v812_v26, 0.0 }
 0x1b8   : > { %v3631_v23 = vpop.f32.mrf.mxu0 }
 0x1b9   : > { %v815_v25 = vadd.f32 %v3631_v23, %v4781_v53  ;;  %3704 = vmatprep.mubr.bf16.mxu1 %v966_v21  ;;  %v926_v31 = vmax.f32 %v804_v24, 0.0 }
 0x1ba   : > { %v806_v27 = vpop.f32.mrf.mxu0  ;;  %3705 = vmatmul.mubr.bf16.gmra.mxu1 %v967_v22 }
 0x1bb   : > { %v807_v28 = vadd.f32 %v4781_v53, %v806_v27  ;;  %v929_v29 = vmax.f32 %v815_v25, 0.0 }
 0x1bc   : > { %v3634_v30 = vpop.f32.mrf.mxu0 }
 0x1bd   : > { %v927_v32 = vmax.f32 %v807_v28, 0.0  ;;  %v969_v36 = vpack.c.bf16 %v929_v29, %v928_v33  ;;  %v828_v40 = vadd.f32 %v3634_v30, %v4781_v53  ;;  %v3998_v28 = vld [vmem:[#allocation10 + $0x38] sm:$0xff]   ;;  %v3999_v29 = vld [vmem:[#allocation10 + $0x30] sm:$0xff]   ;;  %v4000_v30 = vld [vmem:[#allocation10 + $0x28] sm:$0xff]  }
 0x1be   : > { %v819_v34 = vpop.f32.mrf.mxu0  ;;  %3808 = vmatprep.subr.bf16.mxu1 %v3998_v28 }
 0x1bf   : > { %v968_v35 = vpack.c.bf16 %v927_v32, %v926_v31  ;;  %v820_v38 = vadd.f32 %v4781_v53, %v819_v34  ;;  %v932_v47 = vmax.f32 %v828_v40, 0.0  ;;  %3809 = vmatpush3.bf16.msra.mxu1 %v3998_v28 }
 0x1c0   : > { %v3635_v37 = vpop.f32.mrf.mxu0  ;;  %3810 = vmatprep.subr.bf16.mxu1 %v3999_v29 }
 0x1c1   : > { %v831_v39 = vadd.f32 %v3635_v37, %v4781_v53  ;;  %3708 = vmatprep.mubr.bf16.mxu1 %v968_v35  ;;  %v930_v45 = vmax.f32 %v820_v38, 0.0  ;;  %v4001_v38 = vld [vmem:[#allocation10 + $0x20] sm:$0xff]  }
 0x1c2   : > { %v822_v41 = vpop.f32.mrf.mxu0  ;;  %3709 = vmatmul.mubr.bf16.gmra.mxu1 %v969_v36 }
 0x1c3   : > { %v823_v42 = vadd.f32 %v4781_v53, %v822_v41  ;;  %v933_v43 = vmax.f32 %v831_v39, 0.0  ;;  %3811 = vmatpush3.bf16.msra.mxu1 %v3999_v29  ;;  %v4002_v39 = vld [vmem:[#allocation10 + $0x18] sm:$0xff]  }
 0x1c4   : > { %v3638_v44 = vpop.f32.mrf.mxu0  ;;  %3812 = vmatprep.subr.bf16.mxu1 %v4000_v30 }
 0x1c5   : > { %v931_v46 = vmax.f32 %v823_v42, 0.0  ;;  %v971_v50 = vpack.c.bf16 %v933_v43, %v932_v47  ;;  %v844_v55 = vadd.f32 %v3638_v44, %v4781_v53  ;;  %v4003_v47 = vld [vmem:[#allocation10 + $0x10] sm:$0xff]  }
 0x1c6   : > { %v835_v48 = vpop.f32.mrf.mxu0 }
 0x1c7   : > { %v970_v49 = vpack.c.bf16 %v931_v46, %v930_v45  ;;  %v836_v52 = vadd.f32 %v4781_v53, %v835_v48  ;;  %v936_v62 = vmax.f32 %v844_v55, 0.0  ;;  %3813 = vmatpush3.bf16.msra.mxu1 %v4000_v30 }
 0x1c8   : > { %v3639_v51 = vpop.f32.mrf.mxu0  ;;  %3814 = vmatprep.subr.bf16.mxu1 %v4001_v38 }
 0x1c9   : > { %v847_v54 = vadd.f32 %v3639_v51, %v4781_v53  ;;  %3712 = vmatprep.mubr.bf16.mxu1 %v970_v49  ;;  %v934_v60 = vmax.f32 %v836_v52, 0.0 }
 0x1ca   : > { %v838_v56 = vpop.f32.mrf.mxu0  ;;  %3713 = vmatmul.mubr.bf16.gmra.mxu1 %v971_v50 }
 0x1cb   : > { %v839_v57 = vadd.f32 %v4781_v53, %v838_v56  ;;  %v937_v58 = vmax.f32 %v847_v54, 0.0  ;;  %3815 = vmatpush3.bf16.msra.mxu1 %v4001_v38  ;;  %v4004_v56 = vld [vmem:[#allocation10 + $0x8] sm:$0xff]  }
 0x1cc   : > { %v3642_v59 = vpop.f32.mrf.mxu0  ;;  %3816 = vmatprep.subr.bf16.mxu1 %v4002_v39 }
 0x1cd   : > { %v935_v61 = vmax.f32 %v839_v57, 0.0  ;;  %v973_v1 = vpack.c.bf16 %v937_v58, %v936_v62  ;;  %v860_v5 = vadd.f32 %v3642_v59, %v4781_v53 }
 0x1ce   : > { %v851_v63 = vpop.f32.mrf.mxu0 }
 0x1cf   : > { %v972_v0 = vpack.c.bf16 %v935_v61, %v934_v60  ;;  %v852_v3 = vadd.f32 %v4781_v53, %v851_v63  ;;  %v940_v12 = vmax.f32 %v860_v5, 0.0  ;;  %3817 = vmatpush3.bf16.msra.mxu1 %v4002_v39 }
 0x1d0   : > { %v3643_v2 = vpop.f32.mrf.mxu0  ;;  %3818 = vmatprep.subr.bf16.mxu1 %v4003_v47 }
 0x1d1   : > { %v863_v4 = vadd.f32 %v3643_v2, %v4781_v53  ;;  %3716 = vmatprep.mubr.bf16.mxu1 %v972_v0  ;;  %v938_v10 = vmax.f32 %v852_v3, 0.0  ;;  %v4005_v0 = vld [vmem:[#allocation10] sm:$0xff]  }
 0x1d2   : > { %v854_v6 = vpop.f32.mrf.mxu0  ;;  %3717 = vmatmul.mubr.bf16.gmra.mxu1 %v973_v1 }
 0x1d3   : > { %v855_v7 = vadd.f32 %v4781_v53, %v854_v6  ;;  %v941_v8 = vmax.f32 %v863_v4, 0.0  ;;  %3819 = vmatpush3.bf16.msra.mxu1 %v4003_v47 }
 0x1d4   : > { %v3646_v9 = vpop.f32.mrf.mxu0  ;;  %3820 = vmatprep.subr.bf16.mxu1 %v4004_v56 }
 0x1d5   : > { %v939_v11 = vmax.f32 %v855_v7, 0.0  ;;  %v975_v15 = vpack.c.bf16 %v941_v8, %v940_v12  ;;  %v876_v19 = vadd.f32 %v3646_v9, %v4781_v53 }
 0x1d6   : > { %v867_v13 = vpop.f32.mrf.mxu0 }
 0x1d7   : > { %v974_v14 = vpack.c.bf16 %v939_v11, %v938_v10  ;;  %v868_v17 = vadd.f32 %v4781_v53, %v867_v13  ;;  %v944_v25 = vmax.f32 %v876_v19, 0.0  ;;  %3821 = vmatpush3.bf16.msra.mxu1 %v4004_v56 }
 0x1d8   : > { %v3647_v16 = vpop.f32.mrf.mxu0  ;;  %3822 = vmatprep.subr.bf16.mxu1 %v4005_v0 }
 0x1d9   : > { %v879_v18 = vadd.f32 %v3647_v16, %v4781_v53  ;;  %3720 = vmatprep.mubr.bf16.mxu1 %v974_v14  ;;  %v942_v23 = vmax.f32 %v868_v17, 0.0 }
 0x1da   : > { %v870_v20 = vpop.f32.mrf.mxu0  ;;  %3721 = vmatmul.mubr.bf16.gmra.mxu1 %v975_v15 }
 0x1db   : > { %v871_v21 = vadd.f32 %v4781_v53, %v870_v20  ;;  %v945_v22 = vmax.f32 %v879_v18, 0.0  ;;  %v4850_v53 = vld [vmem:[%s5152_s4] ss:$0 sm:$0xff]  ;;  %3823 = vmatpush3.bf16.msra.mxu1 %v4005_v0 }
 0x1dd   : > { %v943_v24 = vmax.f32 %v871_v21, 0.0  ;;  %v977_v27 = vpack.c.bf16 %v945_v22, %v944_v25 }
 0x1df   : > { %v976_v26 = vpack.c.bf16 %v943_v24, %v942_v23 }
 0x1e1   : > { %3724 = vmatprep.mubr.bf16.mxu1 %v976_v26 }
 0x1e2   : > { %3725 = vmatmul.mubr.bf16.gmra.mxu1 %v977_v27 }
 0x22a   : > { %v3666_v31 = vpop.f32.mrf.mxu1 }
 0x22b   : > { %v1092_v36 = vadd.f32 %v3666_v31, %v4850_v53 }
 0x22c   : > { %v1083_v32 = vpop.f32.mrf.mxu1 }
 0x22d   : > { %v1084_v34 = vadd.f32 %v4850_v53, %v1083_v32  ;;  %v1340_v45 = vmax.f32 %v1092_v36, 0.0 }
 0x22e   : > { %v3667_v33 = vpop.f32.mrf.mxu1 }
 0x22f   : > { %v1095_v35 = vadd.f32 %v3667_v33, %v4850_v53  ;;  %v1338_v43 = vmax.f32 %v1084_v34, 0.0 }
 0x230   : > { %v1086_v37 = vpop.f32.mrf.mxu1 }
 0x231   : > { %v1087_v40 = vadd.f32 %v4850_v53, %v1086_v37  ;;  %v1341_v41 = vmax.f32 %v1095_v35, 0.0 }
 0x232   : > { %v3670_v42 = vpop.f32.mrf.mxu1 }
 0x233   : > { %v1339_v44 = vmax.f32 %v1087_v40, 0.0  ;;  %v1403_v49 = vpack.c.bf16 %v1341_v41, %v1340_v45  ;;  %v1108_v54 = vadd.f32 %v3670_v42, %v4850_v53 }
 0x234   : > { %v1099_v46 = vpop.f32.mrf.mxu1 }
 0x235   : > { %v1402_v48 = vpack.c.bf16 %v1339_v44, %v1338_v43  ;;  %v1100_v51 = vadd.f32 %v4850_v53, %v1099_v46  ;;  %v1344_v62 = vmax.f32 %v1108_v54, 0.0 }
 0x236   : > { %v3671_v50 = vpop.f32.mrf.mxu1 }
 0x237   : > { %v1111_v52 = vadd.f32 %v3671_v50, %v4850_v53  ;;  %3744 = vmatprep.mubr.bf16.mxu0 %v1402_v48  ;;  %v1342_v60 = vmax.f32 %v1100_v51, 0.0 }
 0x238   : > { %v1102_v55 = vpop.f32.mrf.mxu1  ;;  %3745 = vmatmul.mubr.bf16.vlgmr.msra.gmra.mxu0 %v1403_v49 }
 0x239   : > { %v1103_v57 = vadd.f32 %v4850_v53, %v1102_v55  ;;  %v1345_v58 = vmax.f32 %v1111_v52, 0.0 }
 0x23a   : > { %v3674_v59 = vpop.f32.mrf.mxu1 }
 0x23b   : > { %v1343_v61 = vmax.f32 %v1103_v57, 0.0  ;;  %v1405_v2 = vpack.c.bf16 %v1345_v58, %v1344_v62  ;;  %v1124_v6 = vadd.f32 %v3674_v59, %v4850_v53 }
 0x23c   : > { %v1115_v63 = vpop.f32.mrf.mxu1 }
 0x23d   : > { %v1404_v1 = vpack.c.bf16 %v1343_v61, %v1342_v60  ;;  %v1116_v4 = vadd.f32 %v4850_v53, %v1115_v63  ;;  %v1348_v13 = vmax.f32 %v1124_v6, 0.0 }
 0x23e   : > { %v3675_v3 = vpop.f32.mrf.mxu1 }
 0x23f   : > { %v1127_v5 = vadd.f32 %v3675_v3, %v4850_v53  ;;  %3748 = vmatprep.mubr.bf16.mxu0 %v1404_v1  ;;  %v1346_v11 = vmax.f32 %v1116_v4, 0.0 }
 0x240   : > { %v1118_v7 = vpop.f32.mrf.mxu1  ;;  %3749 = vmatmul.mubr.bf16.gmra.mxu0 %v1405_v2 }
 0x241   : > { %v1119_v8 = vadd.f32 %v4850_v53, %v1118_v7  ;;  %v1349_v9 = vmax.f32 %v1127_v5, 0.0 }
 0x242   : > { %v3678_v10 = vpop.f32.mrf.mxu1 }
 0x243   : > { %v1347_v12 = vmax.f32 %v1119_v8, 0.0  ;;  %v1407_v16 = vpack.c.bf16 %v1349_v9, %v1348_v13  ;;  %v1140_v20 = vadd.f32 %v3678_v10, %v4850_v53 }
 0x244   : > { %v1131_v14 = vpop.f32.mrf.mxu1 }
 0x245   : > { %v1406_v15 = vpack.c.bf16 %v1347_v12, %v1346_v11  ;;  %v1132_v18 = vadd.f32 %v4850_v53, %v1131_v14  ;;  %v1352_v27 = vmax.f32 %v1140_v20, 0.0 }
 0x246   : > { %v3679_v17 = vpop.f32.mrf.mxu1 }
 0x247   : > { %v1143_v19 = vadd.f32 %v3679_v17, %v4850_v53  ;;  %3752 = vmatprep.mubr.bf16.mxu0 %v1406_v15  ;;  %v1350_v25 = vmax.f32 %v1132_v18, 0.0 }
 0x248   : > { %v1134_v21 = vpop.f32.mrf.mxu1  ;;  %3753 = vmatmul.mubr.bf16.gmra.mxu0 %v1407_v16 }
 0x249   : > { %v1135_v22 = vadd.f32 %v4850_v53, %v1134_v21  ;;  %v1353_v23 = vmax.f32 %v1143_v19, 0.0 }
 0x24a   : > { %v3682_v24 = vpop.f32.mrf.mxu1 }
 0x24b   : > { %v1351_v26 = vmax.f32 %v1135_v22, 0.0  ;;  %v1409_v30 = vpack.c.bf16 %v1353_v23, %v1352_v27  ;;  %v1156_v34 = vadd.f32 %v3682_v24, %v4850_v53 }
 0x24c   : > { %v1147_v28 = vpop.f32.mrf.mxu1 }
 0x24d   : > { %v1408_v29 = vpack.c.bf16 %v1351_v26, %v1350_v25  ;;  %v1148_v32 = vadd.f32 %v4850_v53, %v1147_v28  ;;  %v1356_v41 = vmax.f32 %v1156_v34, 0.0 }
 0x24e   : > { %v3683_v31 = vpop.f32.mrf.mxu1 }
 0x24f   : > { %v1159_v33 = vadd.f32 %v3683_v31, %v4850_v53  ;;  %3756 = vmatprep.mubr.bf16.mxu0 %v1408_v29  ;;  %v1354_v39 = vmax.f32 %v1148_v32, 0.0 }
 0x250   : > { %v1150_v35 = vpop.f32.mrf.mxu1  ;;  %3757 = vmatmul.mubr.bf16.gmra.mxu0 %v1409_v30 }
 0x251   : > { %v1151_v36 = vadd.f32 %v4850_v53, %v1150_v35  ;;  %v1357_v37 = vmax.f32 %v1159_v33, 0.0 }
 0x252   : > { %v3686_v38 = vpop.f32.mrf.mxu1 }
 0x253   : > { %v1355_v40 = vmax.f32 %v1151_v36, 0.0  ;;  %v1411_v44 = vpack.c.bf16 %v1357_v37, %v1356_v41  ;;  %v1172_v48 = vadd.f32 %v3686_v38, %v4850_v53 }
 0x254   : > { %v1163_v42 = vpop.f32.mrf.mxu1 }
 0x255   : > { %v1410_v43 = vpack.c.bf16 %v1355_v40, %v1354_v39  ;;  %v1164_v46 = vadd.f32 %v4850_v53, %v1163_v42  ;;  %v1360_v56 = vmax.f32 %v1172_v48, 0.0 }
 0x256   : > { %v3687_v45 = vpop.f32.mrf.mxu1 }
 0x257   : > { %v1175_v47 = vadd.f32 %v3687_v45, %v4850_v53  ;;  %3760 = vmatprep.mubr.bf16.mxu0 %v1410_v43  ;;  %v1358_v54 = vmax.f32 %v1164_v46, 0.0 }
 0x258   : > { %v1166_v49 = vpop.f32.mrf.mxu1  ;;  %3761 = vmatmul.mubr.bf16.gmra.mxu0 %v1411_v44 }
 0x259   : > { %v1167_v50 = vadd.f32 %v4850_v53, %v1166_v49  ;;  %v1361_v51 = vmax.f32 %v1175_v47, 0.0 }
 0x25a   : > { %v3690_v52 = vpop.f32.mrf.mxu1 }
 0x25b   : > { %v1359_v55 = vmax.f32 %v1167_v50, 0.0  ;;  %v1413_v59 = vpack.c.bf16 %v1361_v51, %v1360_v56  ;;  %v1188_v63 = vadd.f32 %v3690_v52, %v4850_v53 }
 0x25c   : > { %v1179_v57 = vpop.f32.mrf.mxu1 }
 0x25d   : > { %v1412_v58 = vpack.c.bf16 %v1359_v55, %v1358_v54  ;;  %v1180_v61 = vadd.f32 %v4850_v53, %v1179_v57  ;;  %v1364_v6 = vmax.f32 %v1188_v63, 0.0 }
 0x25e   : > { %v3691_v60 = vpop.f32.mrf.mxu1 }
 0x25f   : > { %v1191_v62 = vadd.f32 %v3691_v60, %v4850_v53  ;;  %3764 = vmatprep.mubr.bf16.mxu0 %v1412_v58  ;;  %v1362_v4 = vmax.f32 %v1180_v61, 0.0 }
 0x260   : > { %v1182_v0 = vpop.f32.mrf.mxu1  ;;  %3765 = vmatmul.mubr.bf16.gmra.mxu0 %v1413_v59 }
 0x261   : > { %v1183_v1 = vadd.f32 %v4850_v53, %v1182_v0  ;;  %v1365_v2 = vmax.f32 %v1191_v62, 0.0 }
 0x262   : > { %v3694_v3 = vpop.f32.mrf.mxu1 }
 0x263   : > { %v1363_v5 = vmax.f32 %v1183_v1, 0.0  ;;  %v1415_v9 = vpack.c.bf16 %v1365_v2, %v1364_v6  ;;  %v1204_v13 = vadd.f32 %v3694_v3, %v4850_v53 }
 0x264   : > { %v1195_v7 = vpop.f32.mrf.mxu1 }
 0x265   : > { %v1414_v8 = vpack.c.bf16 %v1363_v5, %v1362_v4  ;;  %v1196_v11 = vadd.f32 %v4850_v53, %v1195_v7  ;;  %v1368_v20 = vmax.f32 %v1204_v13, 0.0 }
 0x266   : > { %v3695_v10 = vpop.f32.mrf.mxu1 }
 0x267   : > { %v1207_v12 = vadd.f32 %v3695_v10, %v4850_v53  ;;  %3768 = vmatprep.mubr.bf16.mxu0 %v1414_v8  ;;  %v1366_v18 = vmax.f32 %v1196_v11, 0.0 }
 0x268   : > { %v1198_v14 = vpop.f32.mrf.mxu1  ;;  %3769 = vmatmul.mubr.bf16.gmra.mxu0 %v1415_v9 }
 0x269   : > { %v1199_v15 = vadd.f32 %v4850_v53, %v1198_v14  ;;  %v1369_v16 = vmax.f32 %v1207_v12, 0.0 }
 0x26a   : > { %v3698_v17 = vpop.f32.mrf.mxu1 }
 0x26b   : > { %v1367_v19 = vmax.f32 %v1199_v15, 0.0  ;;  %v1417_v23 = vpack.c.bf16 %v1369_v16, %v1368_v20  ;;  %v1220_v27 = vadd.f32 %v3698_v17, %v4850_v53 }
 0x26c   : > { %v1211_v21 = vpop.f32.mrf.mxu1 }
 0x26d   : > { %v1416_v22 = vpack.c.bf16 %v1367_v19, %v1366_v18  ;;  %v1212_v25 = vadd.f32 %v4850_v53, %v1211_v21  ;;  %v1372_v34 = vmax.f32 %v1220_v27, 0.0 }
 0x26e   : > { %v3699_v24 = vpop.f32.mrf.mxu1 }
 0x26f   : > { %v1223_v26 = vadd.f32 %v3699_v24, %v4850_v53  ;;  %3772 = vmatprep.mubr.bf16.mxu0 %v1416_v22  ;;  %v1370_v32 = vmax.f32 %v1212_v25, 0.0 }
 0x270   : > { %v1214_v28 = vpop.f32.mrf.mxu1  ;;  %3773 = vmatmul.mubr.bf16.gmra.mxu0 %v1417_v23 }
 0x271   : > { %v1215_v29 = vadd.f32 %v4850_v53, %v1214_v28  ;;  %v1373_v30 = vmax.f32 %v1223_v26, 0.0 }
 0x272   : > { %v3702_v31 = vpop.f32.mrf.mxu1 }
 0x273   : > { %v1371_v33 = vmax.f32 %v1215_v29, 0.0  ;;  %v1419_v37 = vpack.c.bf16 %v1373_v30, %v1372_v34  ;;  %v1236_v41 = vadd.f32 %v3702_v31, %v4850_v53 }
 0x274   : > { %v1227_v35 = vpop.f32.mrf.mxu1 }
 0x275   : > { %v1418_v36 = vpack.c.bf16 %v1371_v33, %v1370_v32  ;;  %v1228_v39 = vadd.f32 %v4850_v53, %v1227_v35  ;;  %v1376_v48 = vmax.f32 %v1236_v41, 0.0 }
 0x276   : > { %v3703_v38 = vpop.f32.mrf.mxu1 }
 0x277   : > { %v1239_v40 = vadd.f32 %v3703_v38, %v4850_v53  ;;  %3776 = vmatprep.mubr.bf16.mxu0 %v1418_v36  ;;  %v1374_v46 = vmax.f32 %v1228_v39, 0.0 }
 0x278   : > { %v1230_v42 = vpop.f32.mrf.mxu1  ;;  %3777 = vmatmul.mubr.bf16.gmra.mxu0 %v1419_v37 }
 0x279   : > { %v1231_v43 = vadd.f32 %v4850_v53, %v1230_v42  ;;  %v1377_v44 = vmax.f32 %v1239_v40, 0.0 }
 0x27a   : > { %v3706_v45 = vpop.f32.mrf.mxu1 }
 0x27b   : > { %v1375_v47 = vmax.f32 %v1231_v43, 0.0  ;;  %v1421_v51 = vpack.c.bf16 %v1377_v44, %v1376_v48  ;;  %v1252_v56 = vadd.f32 %v3706_v45, %v4850_v53 }
 0x27c   : > { %v1243_v49 = vpop.f32.mrf.mxu1 }
 0x27d   : > { %v1420_v50 = vpack.c.bf16 %v1375_v47, %v1374_v46  ;;  %v1244_v54 = vadd.f32 %v4850_v53, %v1243_v49  ;;  %v1380_v63 = vmax.f32 %v1252_v56, 0.0 }
 0x27e   : > { %v3707_v52 = vpop.f32.mrf.mxu1 }
 0x27f   : > { %v1255_v55 = vadd.f32 %v3707_v52, %v4850_v53  ;;  %3780 = vmatprep.mubr.bf16.mxu0 %v1420_v50  ;;  %v1378_v61 = vmax.f32 %v1244_v54, 0.0 }
 0x280   : > { %v1246_v57 = vpop.f32.mrf.mxu1  ;;  %3781 = vmatmul.mubr.bf16.gmra.mxu0 %v1421_v51 }
 0x281   : > { %v1247_v58 = vadd.f32 %v4850_v53, %v1246_v57  ;;  %v1381_v59 = vmax.f32 %v1255_v55, 0.0 }
 0x282   : > { %v3710_v60 = vpop.f32.mrf.mxu1 }
 0x283   : > { %v1379_v62 = vmax.f32 %v1247_v58, 0.0  ;;  %v1423_v2 = vpack.c.bf16 %v1381_v59, %v1380_v63  ;;  %v1268_v6 = vadd.f32 %v3710_v60, %v4850_v53 }
 0x284   : > { %v1259_v0 = vpop.f32.mrf.mxu1 }
 0x285   : > { %v1422_v1 = vpack.c.bf16 %v1379_v62, %v1378_v61  ;;  %v1260_v4 = vadd.f32 %v4850_v53, %v1259_v0  ;;  %v1384_v13 = vmax.f32 %v1268_v6, 0.0 }
 0x286   : > { %v3711_v3 = vpop.f32.mrf.mxu1 }
 0x287   : > { %v1271_v5 = vadd.f32 %v3711_v3, %v4850_v53  ;;  %3784 = vmatprep.mubr.bf16.mxu0 %v1422_v1  ;;  %v1382_v11 = vmax.f32 %v1260_v4, 0.0 }
 0x288   : > { %v1262_v7 = vpop.f32.mrf.mxu1  ;;  %3785 = vmatmul.mubr.bf16.gmra.mxu0 %v1423_v2 }
 0x289   : > { %v1263_v8 = vadd.f32 %v4850_v53, %v1262_v7  ;;  %v1385_v9 = vmax.f32 %v1271_v5, 0.0 }
 0x28a   : > { %v3714_v10 = vpop.f32.mrf.mxu1 }
 0x28b   : > { %v1383_v12 = vmax.f32 %v1263_v8, 0.0  ;;  %v1425_v16 = vpack.c.bf16 %v1385_v9, %v1384_v13  ;;  %v1284_v20 = vadd.f32 %v3714_v10, %v4850_v53  ;;  %v4919_v10 = vld [vmem:[%s5154_s6] ss:$0 sm:$0xff] }
 0x28c   : > { %v1275_v14 = vpop.f32.mrf.mxu1 }
 0x28d   : > { %v1424_v15 = vpack.c.bf16 %v1383_v12, %v1382_v11  ;;  %v1276_v18 = vadd.f32 %v4850_v53, %v1275_v14  ;;  %v1388_v27 = vmax.f32 %v1284_v20, 0.0 }
 0x28e   : > { %v3715_v17 = vpop.f32.mrf.mxu1 }
 0x28f   : > { %v1287_v19 = vadd.f32 %v3715_v17, %v4850_v53  ;;  %3788 = vmatprep.mubr.bf16.mxu0 %v1424_v15  ;;  %v1386_v25 = vmax.f32 %v1276_v18, 0.0 }
 0x290   : > { %v1278_v21 = vpop.f32.mrf.mxu1  ;;  %3789 = vmatmul.mubr.bf16.gmra.mxu0 %v1425_v16 }
 0x291   : > { %v1279_v22 = vadd.f32 %v4850_v53, %v1278_v21  ;;  %v1389_v23 = vmax.f32 %v1287_v19, 0.0 }
 0x292   : > { %v3718_v24 = vpop.f32.mrf.mxu1 }
 0x293   : > { %v1387_v26 = vmax.f32 %v1279_v22, 0.0  ;;  %v1427_v30 = vpack.c.bf16 %v1389_v23, %v1388_v27  ;;  %v1300_v34 = vadd.f32 %v3718_v24, %v4850_v53 }
 0x294   : > { %v1291_v28 = vpop.f32.mrf.mxu1 }
 0x295   : > { %v1426_v29 = vpack.c.bf16 %v1387_v26, %v1386_v25  ;;  %v1292_v32 = vadd.f32 %v4850_v53, %v1291_v28  ;;  %v1392_v41 = vmax.f32 %v1300_v34, 0.0 }
 0x296   : > { %v3719_v31 = vpop.f32.mrf.mxu1 }
 0x297   : > { %v1303_v33 = vadd.f32 %v3719_v31, %v4850_v53  ;;  %3792 = vmatprep.mubr.bf16.mxu0 %v1426_v29  ;;  %v1390_v39 = vmax.f32 %v1292_v32, 0.0 }
 0x298   : > { %v1294_v35 = vpop.f32.mrf.mxu1  ;;  %3793 = vmatmul.mubr.bf16.gmra.mxu0 %v1427_v30 }
 0x299   : > { %v1295_v36 = vadd.f32 %v4850_v53, %v1294_v35  ;;  %v1393_v37 = vmax.f32 %v1303_v33, 0.0 }
 0x29a   : > { %v3722_v38 = vpop.f32.mrf.mxu1 }
 0x29b   : > { %v1391_v40 = vmax.f32 %v1295_v36, 0.0  ;;  %v1429_v44 = vpack.c.bf16 %v1393_v37, %v1392_v41  ;;  %v1316_v48 = vadd.f32 %v3722_v38, %v4850_v53 }
 0x29c   : > { %v1307_v42 = vpop.f32.mrf.mxu1 }
 0x29d   : > { %v1428_v43 = vpack.c.bf16 %v1391_v40, %v1390_v39  ;;  %v1308_v46 = vadd.f32 %v4850_v53, %v1307_v42  ;;  %v1396_v56 = vmax.f32 %v1316_v48, 0.0 }
 0x29e   : > { %v3723_v45 = vpop.f32.mrf.mxu1 }
 0x29f   : > { %v1319_v47 = vadd.f32 %v3723_v45, %v4850_v53  ;;  %3796 = vmatprep.mubr.bf16.mxu0 %v1428_v43  ;;  %v1394_v54 = vmax.f32 %v1308_v46, 0.0 }
 0x2a0   : > { %v1310_v49 = vpop.f32.mrf.mxu1  ;;  %3797 = vmatmul.mubr.bf16.gmra.mxu0 %v1429_v44 }
 0x2a1   : > { %v1311_v50 = vadd.f32 %v4850_v53, %v1310_v49  ;;  %v1397_v51 = vmax.f32 %v1319_v47, 0.0 }
 0x2a2   : > { %v3726_v52 = vpop.f32.mrf.mxu1 }
 0x2a3   : > { %v1395_v55 = vmax.f32 %v1311_v50, 0.0  ;;  %v1431_v59 = vpack.c.bf16 %v1397_v51, %v1396_v56  ;;  %v1332_v63 = vadd.f32 %v3726_v52, %v4850_v53 }
 0x2a4   : > { %v1323_v57 = vpop.f32.mrf.mxu1 }
 0x2a5   : > { %v1430_v58 = vpack.c.bf16 %v1395_v55, %v1394_v54  ;;  %v1324_v61 = vadd.f32 %v4850_v53, %v1323_v57  ;;  %v1400_v5 = vmax.f32 %v1332_v63, 0.0 }
 0x2a6   : > { %v3727_v60 = vpop.f32.mrf.mxu1 }
 0x2a7   : > { %v1335_v62 = vadd.f32 %v3727_v60, %v4850_v53  ;;  %3800 = vmatprep.mubr.bf16.mxu0 %v1430_v58  ;;  %v1398_v3 = vmax.f32 %v1324_v61, 0.0 }
 0x2a8   : > { %v1326_v0 = vpop.f32.mrf.mxu1  ;;  %3801 = vmatmul.mubr.bf16.gmra.mxu0 %v1431_v59 }
 0x2a9   : > { %v1327_v1 = vadd.f32 %v4850_v53, %v1326_v0  ;;  %v1401_v2 = vmax.f32 %v1335_v62, 0.0 }
 0x2ab   : > { %v1399_v4 = vmax.f32 %v1327_v1, 0.0  ;;  %v1433_v7 = vpack.c.bf16 %v1401_v2, %v1400_v5 }
 0x2ad   : > { %v1432_v6 = vpack.c.bf16 %v1399_v4, %v1398_v3 }
 0x2af   : > { %3804 = vmatprep.mubr.bf16.mxu0 %v1432_v6 }
 0x2b0   : > { %3805 = vmatmul.mubr.bf16.gmra.mxu0 %v1433_v7 }
 0x2f8   : > { %v3746_v8 = vpop.f32.mrf.mxu0 }
 0x2f9   : > { %v1548_v13 = vadd.f32 %v3746_v8, %v4919_v10 }
 0x2fa   : > { %v1539_v9 = vpop.f32.mrf.mxu0 }
 0x2fb   : > { %v1540_v12 = vadd.f32 %v4919_v10, %v1539_v9  ;;  %v1796_v20 = vmax.f32 %v1548_v13, 0.0 }
 0x2fc   : > { %v3747_v11 = vpop.f32.mrf.mxu0 }
 0x2fd   : > { %v1551_v53 = vadd.f32 %v3747_v11, %v4919_v10  ;;  %v1794_v18 = vmax.f32 %v1540_v12, 0.0 }
 0x2fe   : > { %v1542_v14 = vpop.f32.mrf.mxu0 }
 0x2ff   : > { %v1543_v15 = vadd.f32 %v4919_v10, %v1542_v14  ;;  %v1797_v16 = vmax.f32 %v1551_v53, 0.0 }
 0x300   : > { %v3750_v17 = vpop.f32.mrf.mxu0 }
 0x301   : > { %v1795_v19 = vmax.f32 %v1543_v15, 0.0  ;;  %v1859_v23 = vpack.c.bf16 %v1797_v16, %v1796_v20  ;;  %v1564_v27 = vadd.f32 %v3750_v17, %v4919_v10 }
 0x302   : > { %v1555_v21 = vpop.f32.mrf.mxu0 }
 0x303   : > { %v1858_v22 = vpack.c.bf16 %v1795_v19, %v1794_v18  ;;  %v1556_v25 = vadd.f32 %v4919_v10, %v1555_v21  ;;  %v1800_v34 = vmax.f32 %v1564_v27, 0.0 }
 0x304   : > { %v3751_v24 = vpop.f32.mrf.mxu0 }
 0x305   : > { %v1567_v26 = vadd.f32 %v3751_v24, %v4919_v10  ;;  %3824 = vmatprep.mubr.bf16.mxu1 %v1858_v22  ;;  %v1798_v32 = vmax.f32 %v1556_v25, 0.0 }
 0x306   : > { %v1558_v28 = vpop.f32.mrf.mxu0  ;;  %3825 = vmatmul.mubr.bf16.vlgmr.msra.gmra.mxu1 %v1859_v23 }
 0x307   : > { %v1559_v29 = vadd.f32 %v4919_v10, %v1558_v28  ;;  %v1801_v30 = vmax.f32 %v1567_v26, 0.0 }
 0x308   : > { %v3754_v31 = vpop.f32.mrf.mxu0 }
 0x309   : > { %v1799_v33 = vmax.f32 %v1559_v29, 0.0  ;;  %v1861_v37 = vpack.c.bf16 %v1801_v30, %v1800_v34  ;;  %v1580_v41 = vadd.f32 %v3754_v31, %v4919_v10 }
 0x30a   : > { %v1571_v35 = vpop.f32.mrf.mxu0 }
 0x30b   : > { %v1860_v36 = vpack.c.bf16 %v1799_v33, %v1798_v32  ;;  %v1572_v39 = vadd.f32 %v4919_v10, %v1571_v35  ;;  %v1804_v48 = vmax.f32 %v1580_v41, 0.0 }
 0x30c   : > { %v3755_v38 = vpop.f32.mrf.mxu0 }
 0x30d   : > { %v1583_v40 = vadd.f32 %v3755_v38, %v4919_v10  ;;  %3828 = vmatprep.mubr.bf16.mxu1 %v1860_v36  ;;  %v1802_v46 = vmax.f32 %v1572_v39, 0.0 }
 0x30e   : > { %v1574_v42 = vpop.f32.mrf.mxu0  ;;  %3829 = vmatmul.mubr.bf16.gmra.mxu1 %v1861_v37 }
 0x30f   : > { %v1575_v43 = vadd.f32 %v4919_v10, %v1574_v42  ;;  %v1805_v44 = vmax.f32 %v1583_v40, 0.0 }
 0x310   : > { %v3758_v45 = vpop.f32.mrf.mxu0 }
 0x311   : > { %v1803_v47 = vmax.f32 %v1575_v43, 0.0  ;;  %v1863_v51 = vpack.c.bf16 %v1805_v44, %v1804_v48  ;;  %v1596_v56 = vadd.f32 %v3758_v45, %v4919_v10 }
 0x312   : > { %v1587_v49 = vpop.f32.mrf.mxu0 }
 0x313   : > { %v1862_v50 = vpack.c.bf16 %v1803_v47, %v1802_v46  ;;  %v1588_v54 = vadd.f32 %v4919_v10, %v1587_v49  ;;  %v1808_v63 = vmax.f32 %v1596_v56, 0.0 }
 0x314   : > { %v3759_v52 = vpop.f32.mrf.mxu0 }
 0x315   : > { %v1599_v55 = vadd.f32 %v3759_v52, %v4919_v10  ;;  %3832 = vmatprep.mubr.bf16.mxu1 %v1862_v50  ;;  %v1806_v61 = vmax.f32 %v1588_v54, 0.0 }
 0x316   : > { %v1590_v57 = vpop.f32.mrf.mxu0  ;;  %3833 = vmatmul.mubr.bf16.gmra.mxu1 %v1863_v51 }
 0x317   : > { %v1591_v58 = vadd.f32 %v4919_v10, %v1590_v57  ;;  %v1809_v59 = vmax.f32 %v1599_v55, 0.0 }
 0x318   : > { %v3762_v60 = vpop.f32.mrf.mxu0 }
 0x319   : > { %v1807_v62 = vmax.f32 %v1591_v58, 0.0  ;;  %v1865_v2 = vpack.c.bf16 %v1809_v59, %v1808_v63  ;;  %v1612_v6 = vadd.f32 %v3762_v60, %v4919_v10 }
 0x31a   : > { %v1603_v0 = vpop.f32.mrf.mxu0 }
 0x31b   : > { %v1864_v1 = vpack.c.bf16 %v1807_v62, %v1806_v61  ;;  %v1604_v4 = vadd.f32 %v4919_v10, %v1603_v0  ;;  %v1812_v13 = vmax.f32 %v1612_v6, 0.0 }
 0x31c   : > { %v3763_v3 = vpop.f32.mrf.mxu0 }
 0x31d   : > { %v1615_v5 = vadd.f32 %v3763_v3, %v4919_v10  ;;  %3836 = vmatprep.mubr.bf16.mxu1 %v1864_v1  ;;  %v1810_v12 = vmax.f32 %v1604_v4, 0.0 }
 0x31e   : > { %v1606_v7 = vpop.f32.mrf.mxu0  ;;  %3837 = vmatmul.mubr.bf16.gmra.mxu1 %v1865_v2 }
 0x31f   : > { %v1607_v8 = vadd.f32 %v4919_v10, %v1606_v7  ;;  %v1813_v9 = vmax.f32 %v1615_v5, 0.0 }
 0x320   : > { %v3766_v11 = vpop.f32.mrf.mxu0 }
 0x321   : > { %v1811_v53 = vmax.f32 %v1607_v8, 0.0  ;;  %v1867_v16 = vpack.c.bf16 %v1813_v9, %v1812_v13  ;;  %v1628_v20 = vadd.f32 %v3766_v11, %v4919_v10 }
 0x322   : > { %v1619_v14 = vpop.f32.mrf.mxu0 }
 0x323   : > { %v1866_v15 = vpack.c.bf16 %v1811_v53, %v1810_v12  ;;  %v1620_v18 = vadd.f32 %v4919_v10, %v1619_v14  ;;  %v1816_v27 = vmax.f32 %v1628_v20, 0.0 }
 0x324   : > { %v3767_v17 = vpop.f32.mrf.mxu0 }
 0x325   : > { %v1631_v19 = vadd.f32 %v3767_v17, %v4919_v10  ;;  %3840 = vmatprep.mubr.bf16.mxu1 %v1866_v15  ;;  %v1814_v25 = vmax.f32 %v1620_v18, 0.0 }
 0x326   : > { %v1622_v21 = vpop.f32.mrf.mxu0  ;;  %3841 = vmatmul.mubr.bf16.gmra.mxu1 %v1867_v16 }
 0x327   : > { %v1623_v22 = vadd.f32 %v4919_v10, %v1622_v21  ;;  %v1817_v23 = vmax.f32 %v1631_v19, 0.0 }
 0x328   : > { %v3770_v24 = vpop.f32.mrf.mxu0 }
 0x329   : > { %v1815_v26 = vmax.f32 %v1623_v22, 0.0  ;;  %v1869_v30 = vpack.c.bf16 %v1817_v23, %v1816_v27  ;;  %v1644_v34 = vadd.f32 %v3770_v24, %v4919_v10 }
 0x32a   : > { %v1635_v28 = vpop.f32.mrf.mxu0 }
 0x32b   : > { %v1868_v29 = vpack.c.bf16 %v1815_v26, %v1814_v25  ;;  %v1636_v32 = vadd.f32 %v4919_v10, %v1635_v28  ;;  %v1820_v41 = vmax.f32 %v1644_v34, 0.0 }
 0x32c   : > { %v3771_v31 = vpop.f32.mrf.mxu0 }
 0x32d   : > { %v1647_v33 = vadd.f32 %v3771_v31, %v4919_v10  ;;  %3844 = vmatprep.mubr.bf16.mxu1 %v1868_v29  ;;  %v1818_v39 = vmax.f32 %v1636_v32, 0.0 }
 0x32e   : > { %v1638_v35 = vpop.f32.mrf.mxu0  ;;  %3845 = vmatmul.mubr.bf16.gmra.mxu1 %v1869_v30 }
 0x32f   : > { %v1639_v36 = vadd.f32 %v4919_v10, %v1638_v35  ;;  %v1821_v37 = vmax.f32 %v1647_v33, 0.0 }
 0x330   : > { %v3774_v38 = vpop.f32.mrf.mxu0 }
 0x331   : > { %v1819_v40 = vmax.f32 %v1639_v36, 0.0  ;;  %v1871_v44 = vpack.c.bf16 %v1821_v37, %v1820_v41  ;;  %v1660_v48 = vadd.f32 %v3774_v38, %v4919_v10 }
 0x332   : > { %v1651_v42 = vpop.f32.mrf.mxu0 }
 0x333   : > { %v1870_v43 = vpack.c.bf16 %v1819_v40, %v1818_v39  ;;  %v1652_v46 = vadd.f32 %v4919_v10, %v1651_v42  ;;  %v1824_v56 = vmax.f32 %v1660_v48, 0.0 }
 0x334   : > { %v3775_v45 = vpop.f32.mrf.mxu0 }
 0x335   : > { %v1663_v47 = vadd.f32 %v3775_v45, %v4919_v10  ;;  %3848 = vmatprep.mubr.bf16.mxu1 %v1870_v43  ;;  %v1822_v54 = vmax.f32 %v1652_v46, 0.0 }
 0x336   : > { %v1654_v49 = vpop.f32.mrf.mxu0  ;;  %3849 = vmatmul.mubr.bf16.gmra.mxu1 %v1871_v44 }
 0x337   : > { %v1655_v50 = vadd.f32 %v4919_v10, %v1654_v49  ;;  %v1825_v51 = vmax.f32 %v1663_v47, 0.0 }
 0x338   : > { %v3778_v52 = vpop.f32.mrf.mxu0 }
 0x339   : > { %v1823_v55 = vmax.f32 %v1655_v50, 0.0  ;;  %v1873_v59 = vpack.c.bf16 %v1825_v51, %v1824_v56  ;;  %v1676_v63 = vadd.f32 %v3778_v52, %v4919_v10 }
 0x33a   : > { %v1667_v57 = vpop.f32.mrf.mxu0 }
 0x33b   : > { %v1872_v58 = vpack.c.bf16 %v1823_v55, %v1822_v54  ;;  %v1668_v61 = vadd.f32 %v4919_v10, %v1667_v57  ;;  %v1828_v6 = vmax.f32 %v1676_v63, 0.0 }
 0x33c   : > { %v3779_v60 = vpop.f32.mrf.mxu0 }
 0x33d   : > { %v1679_v62 = vadd.f32 %v3779_v60, %v4919_v10  ;;  %3852 = vmatprep.mubr.bf16.mxu1 %v1872_v58  ;;  %v1826_v4 = vmax.f32 %v1668_v61, 0.0 }
 0x33e   : > { %v1670_v0 = vpop.f32.mrf.mxu0  ;;  %3853 = vmatmul.mubr.bf16.gmra.mxu1 %v1873_v59 }
 0x33f   : > { %v1671_v1 = vadd.f32 %v4919_v10, %v1670_v0  ;;  %v1829_v2 = vmax.f32 %v1679_v62, 0.0 }
 0x340   : > { %v3782_v3 = vpop.f32.mrf.mxu0 }
 0x341   : > { %v1827_v5 = vmax.f32 %v1671_v1, 0.0  ;;  %v1875_v9 = vpack.c.bf16 %v1829_v2, %v1828_v6  ;;  %v1692_v13 = vadd.f32 %v3782_v3, %v4919_v10 }
 0x342   : > { %v1683_v7 = vpop.f32.mrf.mxu0 }
 0x343   : > { %v1874_v8 = vpack.c.bf16 %v1827_v5, %v1826_v4  ;;  %v1684_v12 = vadd.f32 %v4919_v10, %v1683_v7  ;;  %v1832_v20 = vmax.f32 %v1692_v13, 0.0 }
 0x344   : > { %v3783_v11 = vpop.f32.mrf.mxu0 }
 0x345   : > { %v1695_v53 = vadd.f32 %v3783_v11, %v4919_v10  ;;  %3856 = vmatprep.mubr.bf16.mxu1 %v1874_v8  ;;  %v1830_v18 = vmax.f32 %v1684_v12, 0.0 }
 0x346   : > { %v1686_v14 = vpop.f32.mrf.mxu0  ;;  %3857 = vmatmul.mubr.bf16.gmra.mxu1 %v1875_v9 }
 0x347   : > { %v1687_v15 = vadd.f32 %v4919_v10, %v1686_v14  ;;  %v1833_v16 = vmax.f32 %v1695_v53, 0.0 }
 0x348   : > { %v3786_v17 = vpop.f32.mrf.mxu0 }
 0x349   : > { %v1831_v19 = vmax.f32 %v1687_v15, 0.0  ;;  %v1877_v23 = vpack.c.bf16 %v1833_v16, %v1832_v20  ;;  %v1708_v27 = vadd.f32 %v3786_v17, %v4919_v10 }
 0x34a   : > { %v1699_v21 = vpop.f32.mrf.mxu0 }
 0x34b   : > { %v1876_v22 = vpack.c.bf16 %v1831_v19, %v1830_v18  ;;  %v1700_v25 = vadd.f32 %v4919_v10, %v1699_v21  ;;  %v1836_v34 = vmax.f32 %v1708_v27, 0.0 }
 0x34c   : > { %v3787_v24 = vpop.f32.mrf.mxu0 }
 0x34d   : > { %v1711_v26 = vadd.f32 %v3787_v24, %v4919_v10  ;;  %3860 = vmatprep.mubr.bf16.mxu1 %v1876_v22  ;;  %v1834_v32 = vmax.f32 %v1700_v25, 0.0 }
 0x34e   : > { %v1702_v28 = vpop.f32.mrf.mxu0  ;;  %3861 = vmatmul.mubr.bf16.gmra.mxu1 %v1877_v23 }
 0x34f   : > { %v1703_v29 = vadd.f32 %v4919_v10, %v1702_v28  ;;  %v1837_v30 = vmax.f32 %v1711_v26, 0.0 }
 0x350   : > { %v3790_v31 = vpop.f32.mrf.mxu0 }
 0x351   : > { %v1835_v33 = vmax.f32 %v1703_v29, 0.0  ;;  %v1879_v37 = vpack.c.bf16 %v1837_v30, %v1836_v34  ;;  %v1724_v41 = vadd.f32 %v3790_v31, %v4919_v10 }
 0x352   : > { %v1715_v35 = vpop.f32.mrf.mxu0 }
 0x353   : > { %v1878_v36 = vpack.c.bf16 %v1835_v33, %v1834_v32  ;;  %v1716_v39 = vadd.f32 %v4919_v10, %v1715_v35  ;;  %v1840_v48 = vmax.f32 %v1724_v41, 0.0 }
 0x354   : > { %v3791_v38 = vpop.f32.mrf.mxu0 }
 0x355   : > { %v1727_v40 = vadd.f32 %v3791_v38, %v4919_v10  ;;  %3864 = vmatprep.mubr.bf16.mxu1 %v1878_v36  ;;  %v1838_v46 = vmax.f32 %v1716_v39, 0.0 }
 0x356   : > { %v1718_v42 = vpop.f32.mrf.mxu0  ;;  %3865 = vmatmul.mubr.bf16.gmra.mxu1 %v1879_v37 }
 0x357   : > { %v1719_v43 = vadd.f32 %v4919_v10, %v1718_v42  ;;  %v1841_v44 = vmax.f32 %v1727_v40, 0.0 }
 0x358   : > { %v3794_v45 = vpop.f32.mrf.mxu0 }
 0x359   : > { %v1839_v47 = vmax.f32 %v1719_v43, 0.0  ;;  %v1881_v51 = vpack.c.bf16 %v1841_v44, %v1840_v48  ;;  %v1740_v56 = vadd.f32 %v3794_v45, %v4919_v10  ;;  %v4988_v43 = vld [vmem:[%s5156_s8] ss:$0 sm:$0xff] }
 0x35a   : > { %v1731_v49 = vpop.f32.mrf.mxu0 }
 0x35b   : > { %v1880_v50 = vpack.c.bf16 %v1839_v47, %v1838_v46  ;;  %v1732_v54 = vadd.f32 %v4919_v10, %v1731_v49  ;;  %v1844_v63 = vmax.f32 %v1740_v56, 0.0 }
 0x35c   : > { %v3795_v52 = vpop.f32.mrf.mxu0 }
 0x35d   : > { %v1743_v55 = vadd.f32 %v3795_v52, %v4919_v10  ;;  %3868 = vmatprep.mubr.bf16.mxu1 %v1880_v50  ;;  %v1842_v61 = vmax.f32 %v1732_v54, 0.0 }
 0x35e   : > { %v1734_v57 = vpop.f32.mrf.mxu0  ;;  %3869 = vmatmul.mubr.bf16.gmra.mxu1 %v1881_v51 }
 0x35f   : > { %v1735_v58 = vadd.f32 %v4919_v10, %v1734_v57  ;;  %v1845_v59 = vmax.f32 %v1743_v55, 0.0 }
 0x360   : > { %v3798_v60 = vpop.f32.mrf.mxu0 }
 0x361   : > { %v1843_v62 = vmax.f32 %v1735_v58, 0.0  ;;  %v1883_v2 = vpack.c.bf16 %v1845_v59, %v1844_v63  ;;  %v1756_v6 = vadd.f32 %v3798_v60, %v4919_v10 }
 0x362   : > { %v1747_v0 = vpop.f32.mrf.mxu0 }
 0x363   : > { %v1882_v1 = vpack.c.bf16 %v1843_v62, %v1842_v61  ;;  %v1748_v4 = vadd.f32 %v4919_v10, %v1747_v0  ;;  %v1848_v13 = vmax.f32 %v1756_v6, 0.0 }
 0x364   : > { %v3799_v3 = vpop.f32.mrf.mxu0 }
 0x365   : > { %v1759_v5 = vadd.f32 %v3799_v3, %v4919_v10  ;;  %3872 = vmatprep.mubr.bf16.mxu1 %v1882_v1  ;;  %v1846_v12 = vmax.f32 %v1748_v4, 0.0 }
 0x366   : > { %v1750_v7 = vpop.f32.mrf.mxu0  ;;  %3873 = vmatmul.mubr.bf16.gmra.mxu1 %v1883_v2 }
 0x367   : > { %v1751_v8 = vadd.f32 %v4919_v10, %v1750_v7  ;;  %v1849_v9 = vmax.f32 %v1759_v5, 0.0 }
 0x368   : > { %v3802_v11 = vpop.f32.mrf.mxu0 }
 0x369   : > { %v1847_v53 = vmax.f32 %v1751_v8, 0.0  ;;  %v1885_v16 = vpack.c.bf16 %v1849_v9, %v1848_v13  ;;  %v1772_v20 = vadd.f32 %v3802_v11, %v4919_v10 }
 0x36a   : > { %v1763_v14 = vpop.f32.mrf.mxu0 }
 0x36b   : > { %v1884_v15 = vpack.c.bf16 %v1847_v53, %v1846_v12  ;;  %v1764_v18 = vadd.f32 %v4919_v10, %v1763_v14  ;;  %v1852_v27 = vmax.f32 %v1772_v20, 0.0 }
 0x36c   : > { %v3803_v17 = vpop.f32.mrf.mxu0 }
 0x36d   : > { %v1775_v19 = vadd.f32 %v3803_v17, %v4919_v10  ;;  %3876 = vmatprep.mubr.bf16.mxu1 %v1884_v15  ;;  %v1850_v25 = vmax.f32 %v1764_v18, 0.0 }
 0x36e   : > { %v1766_v21 = vpop.f32.mrf.mxu0  ;;  %3877 = vmatmul.mubr.bf16.gmra.mxu1 %v1885_v16 }
 0x36f   : > { %v1767_v22 = vadd.f32 %v4919_v10, %v1766_v21  ;;  %v1853_v23 = vmax.f32 %v1775_v19, 0.0 }
 0x370   : > { %v3806_v24 = vpop.f32.mrf.mxu0 }
 0x371   : > { %v1851_v26 = vmax.f32 %v1767_v22, 0.0  ;;  %v1887_v30 = vpack.c.bf16 %v1853_v23, %v1852_v27  ;;  %v1788_v34 = vadd.f32 %v3806_v24, %v4919_v10 }
 0x372   : > { %v1779_v28 = vpop.f32.mrf.mxu0 }
 0x373   : > { %v1886_v29 = vpack.c.bf16 %v1851_v26, %v1850_v25  ;;  %v1780_v32 = vadd.f32 %v4919_v10, %v1779_v28  ;;  %v1856_v40 = vmax.f32 %v1788_v34, 0.0 }
 0x374   : > { %v3807_v31 = vpop.f32.mrf.mxu0 }
 0x375   : > { %v1791_v33 = vadd.f32 %v3807_v31, %v4919_v10  ;;  %3880 = vmatprep.mubr.bf16.mxu1 %v1886_v29  ;;  %v1854_v38 = vmax.f32 %v1780_v32, 0.0 }
 0x376   : > { %v1782_v35 = vpop.f32.mrf.mxu0  ;;  %3881 = vmatmul.mubr.bf16.gmra.mxu1 %v1887_v30 }
 0x377   : > { %v1783_v36 = vadd.f32 %v4919_v10, %v1782_v35  ;;  %v1857_v37 = vmax.f32 %v1791_v33, 0.0 }
 0x379   : > { %v1855_v39 = vmax.f32 %v1783_v36, 0.0  ;;  %v1889_v42 = vpack.c.bf16 %v1857_v37, %v1856_v40 }
 0x37b   : > { %v1888_v41 = vpack.c.bf16 %v1855_v39, %v1854_v38 }
 0x37d   : > { %3884 = vmatprep.mubr.bf16.mxu1 %v1888_v41 }
 0x37e   : > { %3885 = vmatmul.mubr.bf16.gmra.mxu1 %v1889_v42 }
 0x3c6   : > { %v3826_v44 = vpop.f32.mrf.mxu1 }
 0x3c7   : > { %v2004_v45 = vadd.f32 %v3826_v44, %v4988_v43 }
 0x3c8   : > { %v1995_v46 = vpop.f32.mrf.mxu1 }
 0x3c9   : > { %v2252_v47 = vsub.f32 0.0, %v2004_v45  ;;  %v1996_v10 = vadd.f32 %v4988_v43, %v1995_v46 }
 0x3ca   : > { %v3827_v48 = vpop.f32.mrf.mxu1 }
 0x3cb   : > { %v2318_v49 = vmul.f32 1.442695, %v2252_v47  ;;  %v2250_v50 = vsub.f32 0.0, %v1996_v10  ;;  %v2007_v51 = vadd.f32 %v3827_v48, %v4988_v43 }
 0x3cc   : > { %v1998_v52 = vpop.f32.mrf.mxu1 }
 0x3cd   : > { %4006 = vpow2.f32 %v2318_v49  ;;  %v2314_v54 = vmul.f32 1.442695, %v2250_v50  ;;  %v2253_v55 = vsub.f32 0.0, %v2007_v51  ;;  %v1999_v56 = vadd.f32 %v4988_v43, %v1998_v52 }
 0x3ce   : > { %v3830_v57 = vpop.f32.mrf.mxu1 }
 0x3cf   : > { %4008 = vpow2.f32 %v2314_v54  ;;  %v2320_v58 = vmul.f32 1.442695, %v2253_v55  ;;  %v2251_v59 = vsub.f32 0.0, %v1999_v56  ;;  %v2020_v60 = vadd.f32 %v3830_v57, %v4988_v43 }
 0x3d0   : > { %v2011_v61 = vpop.f32.mrf.mxu1 }
 0x3d1   : > { %4010 = vpow2.f32 %v2320_v58  ;;  %v2316_v62 = vmul.f32 1.442695, %v2251_v59  ;;  %v2256_v63 = vsub.f32 0.0, %v2020_v60  ;;  %v2012_v0 = vadd.f32 %v4988_v43, %v2011_v61 }
 0x3d2   : > { %v3831_v1 = vpop.f32.mrf.mxu1 }
 0x3d3   : > { %4012 = vpow2.f32 %v2316_v62  ;;  %v2326_v2 = vmul.f32 1.442695, %v2256_v63  ;;  %v2254_v3 = vsub.f32 0.0, %v2012_v0  ;;  %v2023_v4 = vadd.f32 %v3831_v1, %v4988_v43 }
 0x3d4   : > { %v2014_v5 = vpop.f32.mrf.mxu1 }
 0x3d5   : > { %4014 = vpow2.f32 %v2326_v2  ;;  %v2322_v6 = vmul.f32 1.442695, %v2254_v3  ;;  %v2257_v7 = vsub.f32 0.0, %v2023_v4  ;;  %v2015_v8 = vadd.f32 %v4988_v43, %v2014_v5 }
 0x3d6   : > { %v3834_v9 = vpop.f32.mrf.mxu1 }
 0x3d7   : > { %4016 = vpow2.f32 %v2322_v6  ;;  %v2328_v11 = vmul.f32 1.442695, %v2257_v7  ;;  %v2255_v12 = vsub.f32 0.0, %v2015_v8  ;;  %v2036_v53 = vadd.f32 %v3834_v9, %v4988_v43 }
 0x3d8   : > { %v2027_v13 = vpop.f32.mrf.mxu1 }
 0x3d9   : > { %4018 = vpow2.f32 %v2328_v11  ;;  %v2324_v14 = vmul.f32 1.442695, %v2255_v12  ;;  %v2260_v15 = vsub.f32 0.0, %v2036_v53  ;;  %v2028_v16 = vadd.f32 %v4988_v43, %v2027_v13 }
 0x3da   : > { %v4007_v17 = vpop.eup %4006  ;;  %v3835_v18 = vpop.f32.mrf.mxu1 }
 0x3db   : > { %v2444_v19 = vadd.f32 1.0, %v4007_v17  ;;  %4020 = vpow2.f32 %v2324_v14  ;;  %v2334_v20 = vmul.f32 1.442695, %v2260_v15  ;;  %v2258_v21 = vsub.f32 0.0, %v2028_v16 }
 0x3dc   : > { %v4009_v22 = vpop.eup %4008  ;;  %v2039_v23 = vadd.f32 %v3835_v18, %v4988_v43  ;;  %v2030_v24 = vpop.f32.mrf.mxu1 }
 0x3dd   : > { %4022 = vrcp.f32 %v2444_v19  ;;  %v2442_v25 = vadd.f32 1.0, %v4009_v22  ;;  %v2330_v26 = vmul.f32 1.442695, %v2258_v21  ;;  %v2031_v27 = vadd.f32 %v4988_v43, %v2030_v24 }
 0x3de   : > { %v4011_v28 = vpop.eup %4010  ;;  %4024 = vpow2.f32 %v2334_v20  ;;  %v2261_v29 = vsub.f32 0.0, %v2039_v23  ;;  %v3838_v30 = vpop.f32.mrf.mxu1 }
 0x3df   : > { %4026 = vrcp.f32 %v2442_v25  ;;  %v2445_v31 = vadd.f32 1.0, %v4011_v28  ;;  %v2259_v32 = vsub.f32 0.0, %v2031_v27  ;;  %v2052_v33 = vadd.f32 %v3838_v30, %v4988_v43 }
 0x3e0   : > { %v4013_v34 = vpop.eup %4012  ;;  %4028 = vpow2.f32 %v2330_v26  ;;  %v2336_v35 = vmul.f32 1.442695, %v2261_v29  ;;  %v2043_v36 = vpop.f32.mrf.mxu1 }
 0x3e1   : > { %4030 = vrcp.f32 %v2445_v31  ;;  %v2443_v37 = vadd.f32 1.0, %v4013_v34  ;;  %v2332_v38 = vmul.f32 1.442695, %v2259_v32  ;;  %v2264_v39 = vsub.f32 0.0, %v2052_v33 }
 0x3e2   : > { %v4015_v40 = vpop.eup %4014  ;;  %4032 = vpow2.f32 %v2336_v35  ;;  %v2044_v41 = vadd.f32 %v4988_v43, %v2043_v36  ;;  %v3839_v42 = vpop.f32.mrf.mxu1 }
 0x3e3   : > { %4034 = vrcp.f32 %v2443_v37  ;;  %v2448_v44 = vadd.f32 1.0, %v4015_v40  ;;  %v2342_v45 = vmul.f32 1.442695, %v2264_v39  ;;  %v2055_v46 = vadd.f32 %v3839_v42, %v4988_v43 }
 0x3e4   : > { %v4017_v47 = vpop.eup %4016  ;;  %4036 = vpow2.f32 %v2332_v38  ;;  %v2262_v10 = vsub.f32 0.0, %v2044_v41  ;;  %v2046_v48 = vpop.f32.mrf.mxu1 }
 0x3e5   : > { %4038 = vrcp.f32 %v2448_v44  ;;  %v2446_v49 = vadd.f32 1.0, %v4017_v47  ;;  %v2265_v50 = vsub.f32 0.0, %v2055_v46  ;;  %v2047_v51 = vadd.f32 %v4988_v43, %v2046_v48 }
 0x3e6   : > { %v4019_v52 = vpop.eup %4018  ;;  %4040 = vpow2.f32 %v2342_v45  ;;  %v2338_v54 = vmul.f32 1.442695, %v2262_v10  ;;  %v3842_v55 = vpop.f32.mrf.mxu1 }
 0x3e7   : > { %4042 = vrcp.f32 %v2446_v49  ;;  %v2449_v56 = vadd.f32 1.0, %v4019_v52  ;;  %v2344_v57 = vmul.f32 1.442695, %v2265_v50  ;;  %v2263_v58 = vsub.f32 0.0, %v2047_v51 }
 0x3e8   : > { %v4021_v59 = vpop.eup %4020  ;;  %4044 = vpow2.f32 %v2338_v54  ;;  %v2068_v60 = vadd.f32 %v3842_v55, %v4988_v43  ;;  %v2059_v61 = vpop.f32.mrf.mxu1 }
 0x3e9   : > { %4046 = vrcp.f32 %v2449_v56  ;;  %v2447_v62 = vadd.f32 1.0, %v4021_v59  ;;  %v2340_v63 = vmul.f32 1.442695, %v2263_v58  ;;  %v2060_v0 = vadd.f32 %v4988_v43, %v2059_v61 }
 0x3ea   : > { %v4023_v1 = vpop.eup %4022  ;;  %4048 = vpow2.f32 %v2344_v57  ;;  %v2268_v2 = vsub.f32 0.0, %v2068_v60  ;;  %v3843_v3 = vpop.f32.mrf.mxu1 }
 0x3eb   : > { %v4025_v4 = vpop.eup %4024  ;;  %4050 = vrcp.f32 %v2447_v62  ;;  %v2266_v5 = vsub.f32 0.0, %v2060_v0  ;;  %v2071_v6 = vadd.f32 %v3843_v3, %v4988_v43 }
 0x3ec   : > { %v4027_v7 = vpop.eup %4026  ;;  %v2452_v8 = vadd.f32 1.0, %v4025_v4  ;;  %4052 = vpow2.f32 %v2340_v63  ;;  %v2350_v9 = vmul.f32 1.442695, %v2268_v2  ;;  %v2062_v11 = vpop.f32.mrf.mxu1 }
 0x3ed   : > { %v4029_v12 = vpop.eup %4028  ;;  %v2346_v53 = vmul.f32 1.442695, %v2266_v5  ;;  %v2269_v13 = vsub.f32 0.0, %v2071_v6  ;;  %v2063_v14 = vadd.f32 %v4988_v43, %v2062_v11 }
 0x3ee   : > { %v4031_v15 = vpop.eup %4030  ;;  %4054 = vrcp.f32 %v2452_v8  ;;  %v2450_v16 = vadd.f32 1.0, %v4029_v12  ;;  %v3846_v17 = vpop.f32.mrf.mxu1 }
 0x3ef   : > { %v4033_v18 = vpop.eup %4032  ;;  %v3225_v19 = vpack.c.bf16 %v4031_v15, %v4023_v1  ;;  %4056 = vpow2.f32 %v2350_v9  ;;  %v2352_v20 = vmul.f32 1.442695, %v2269_v13  ;;  %v2267_v21 = vsub.f32 0.0, %v2063_v14 }
 0x3f0   : > { %v4035_v22 = vpop.eup %4034  ;;  %4058 = vrcp.f32 %v2450_v16  ;;  %v2453_v23 = vadd.f32 1.0, %v4033_v18  ;;  %v2084_v24 = vadd.f32 %v3846_v17, %v4988_v43  ;;  %v2075_v25 = vpop.f32.mrf.mxu1 }
 0x3f1   : > { %v4037_v26 = vpop.eup %4036  ;;  %3377 = vst [vmem:[%s5012_s27 + $0x8] sm:$0xff] %v3225_v19   ;;  %v3220_v27 = vpack.c.bf16 %v4035_v22, %v4027_v7  ;;  %4060 = vpow2.f32 %v2346_v53  ;;  %v2348_v28 = vmul.f32 1.442695, %v2267_v21  ;;  %v2076_v29 = vadd.f32 %v4988_v43, %v2075_v25 }
 0x3f2   : > { %v4039_v30 = vpop.eup %4038  ;;  %4062 = vrcp.f32 %v2453_v23  ;;  %v2451_v31 = vadd.f32 1.0, %v4037_v26  ;;  %v2272_v32 = vsub.f32 0.0, %v2084_v24  ;;  %v3847_v33 = vpop.f32.mrf.mxu1 }
 0x3f3   : > { %v4041_v34 = vpop.eup %4040  ;;  %3221 = vst [vmem:[%s5012_s27] sm:$0xff] %v3220_v27   ;;  %4064 = vpow2.f32 %v2352_v20  ;;  %v2270_v35 = vsub.f32 0.0, %v2076_v29  ;;  %v2087_v36 = vadd.f32 %v3847_v33, %v4988_v43 }
 0x3f4   : > { %v4043_v37 = vpop.eup %4042  ;;  %4066 = vrcp.f32 %v2451_v31  ;;  %v2456_v38 = vadd.f32 1.0, %v4041_v34  ;;  %v2358_v39 = vmul.f32 1.442695, %v2272_v32  ;;  %v2078_v40 = vpop.f32.mrf.mxu1 }
 0x3f5   : > { %v4045_v41 = vpop.eup %4044  ;;  %4068 = vpow2.f32 %v2348_v28  ;;  %v2354_v42 = vmul.f32 1.442695, %v2270_v35  ;;  %v2273_v44 = vsub.f32 0.0, %v2087_v36  ;;  %v2079_v45 = vadd.f32 %v4988_v43, %v2078_v40 }
 0x3f6   : > { %v4047_v46 = vpop.eup %4046  ;;  %4070 = vrcp.f32 %v2456_v38  ;;  %v2454_v47 = vadd.f32 1.0, %v4045_v41  ;;  %v3850_v10 = vpop.f32.mrf.mxu1 }
 0x3f7   : > { %v4049_v48 = vpop.eup %4048  ;;  %v3235_v49 = vpack.c.bf16 %v4047_v46, %v4039_v30  ;;  %4072 = vpow2.f32 %v2358_v39  ;;  %v2360_v50 = vmul.f32 1.442695, %v2273_v44  ;;  %v2271_v51 = vsub.f32 0.0, %v2079_v45 }
 0x3f8   : > { %v4051_v52 = vpop.eup %4050  ;;  %4074 = vrcp.f32 %v2454_v47  ;;  %v2457_v54 = vadd.f32 1.0, %v4049_v48  ;;  %v2100_v55 = vadd.f32 %v3850_v10, %v4988_v43  ;;  %v2091_v56 = vpop.f32.mrf.mxu1 }
 0x3f9   : > { %v4053_v57 = vpop.eup %4052  ;;  %3379 = vst [vmem:[%s5012_s27 + $0x18] sm:$0xff] %v3235_v49   ;;  %v3230_v58 = vpack.c.bf16 %v4051_v52, %v4043_v37  ;;  %4076 = vpow2.f32 %v2354_v42  ;;  %v2356_v59 = vmul.f32 1.442695, %v2271_v51  ;;  %v2092_v60 = vadd.f32 %v4988_v43, %v2091_v56 }
 0x3fa   : > { %4078 = vrcp.f32 %v2457_v54  ;;  %v2455_v61 = vadd.f32 1.0, %v4053_v57  ;;  %v2276_v62 = vsub.f32 0.0, %v2100_v55  ;;  %v3851_v63 = vpop.f32.mrf.mxu1 }
 0x3fb   : > { %v4055_v0 = vpop.eup %4054  ;;  %3378 = vst [vmem:[%s5012_s27 + $0x10] sm:$0xff] %v3230_v58   ;;  %4080 = vpow2.f32 %v2360_v50  ;;  %v2274_v1 = vsub.f32 0.0, %v2092_v60  ;;  %v2103_v2 = vadd.f32 %v3851_v63, %v4988_v43 }
 0x3fc   : > { %v4057_v3 = vpop.eup %4056  ;;  %4082 = vrcp.f32 %v2455_v61  ;;  %v2366_v4 = vmul.f32 1.442695, %v2276_v62  ;;  %v2094_v5 = vpop.f32.mrf.mxu1 }
 0x3fd   : > { %v4059_v6 = vpop.eup %4058  ;;  %v2460_v7 = vadd.f32 1.0, %v4057_v3  ;;  %4084 = vpow2.f32 %v2356_v59  ;;  %v2362_v8 = vmul.f32 1.442695, %v2274_v1  ;;  %v2277_v9 = vsub.f32 0.0, %v2103_v2 }
 0x3fe   : > { %v4061_v11 = vpop.eup %4060  ;;  %4086 = vpow2.f32 %v2366_v4  ;;  %v2095_v12 = vadd.f32 %v4988_v43, %v2094_v5  ;;  %v3854_v53 = vpop.f32.mrf.mxu1 }
 0x3ff   : > { %v4063_v13 = vpop.eup %4062  ;;  %4088 = vrcp.f32 %v2460_v7  ;;  %v2458_v14 = vadd.f32 1.0, %v4061_v11  ;;  %v2368_v15 = vmul.f32 1.442695, %v2277_v9  ;;  %v2116_v16 = vadd.f32 %v3854_v53, %v4988_v43 }
 0x400   : > { %v4065_v17 = vpop.eup %4064  ;;  %v3245_v18 = vpack.c.bf16 %v4063_v13, %v4055_v0  ;;  %4090 = vpow2.f32 %v2362_v8  ;;  %v2275_v19 = vsub.f32 0.0, %v2095_v12  ;;  %v2107_v20 = vpop.f32.mrf.mxu1 }
 0x401   : > { %v4067_v21 = vpop.eup %4066  ;;  %4092 = vrcp.f32 %v2458_v14  ;;  %v2461_v22 = vadd.f32 1.0, %v4065_v17  ;;  %v2280_v23 = vsub.f32 0.0, %v2116_v16  ;;  %v2108_v24 = vadd.f32 %v4988_v43, %v2107_v20 }
 0x402   : > { %v4069_v25 = vpop.eup %4068  ;;  %3381 = vst [vmem:[%s5012_s27 + $0x28] sm:$0xff] %v3245_v18   ;;  %v3240_v26 = vpack.c.bf16 %v4067_v21, %v4059_v6  ;;  %4094 = vpow2.f32 %v2368_v15  ;;  %v2364_v27 = vmul.f32 1.442695, %v2275_v19  ;;  %v3855_v28 = vpop.f32.mrf.mxu1 }
 0x403   : > { %v4071_v29 = vpop.eup %4070  ;;  %4096 = vrcp.f32 %v2461_v22  ;;  %v2459_v30 = vadd.f32 1.0, %v4069_v25  ;;  %v2374_v31 = vmul.f32 1.442695, %v2280_v23  ;;  %v2278_v32 = vsub.f32 0.0, %v2108_v24 }
 0x404   : > { %v4073_v33 = vpop.eup %4072  ;;  %3380 = vst [vmem:[%s5012_s27 + $0x20] sm:$0xff] %v3240_v26   ;;  %4098 = vpow2.f32 %v2364_v27  ;;  %v2119_v34 = vadd.f32 %v3855_v28, %v4988_v43  ;;  %v2110_v35 = vpop.f32.mrf.mxu1 }
 0x405   : > { %v4075_v36 = vpop.eup %4074  ;;  %4100 = vrcp.f32 %v2459_v30  ;;  %v2464_v37 = vadd.f32 1.0, %v4073_v33  ;;  %v2370_v38 = vmul.f32 1.442695, %v2278_v32  ;;  %v2111_v39 = vadd.f32 %v4988_v43, %v2110_v35 }
 0x406   : > { %v4077_v40 = vpop.eup %4076  ;;  %4102 = vpow2.f32 %v2374_v31  ;;  %v2281_v41 = vsub.f32 0.0, %v2119_v34  ;;  %v3858_v42 = vpop.f32.mrf.mxu1 }
 0x407   : > { %v4079_v44 = vpop.eup %4078  ;;  %4104 = vrcp.f32 %v2464_v37  ;;  %v2462_v45 = vadd.f32 1.0, %v4077_v40  ;;  %v2279_v46 = vsub.f32 0.0, %v2111_v39  ;;  %v2132_v47 = vadd.f32 %v3858_v42, %v4988_v43 }
 0x408   : > { %v4081_v10 = vpop.eup %4080  ;;  %v3255_v48 = vpack.c.bf16 %v4079_v44, %v4071_v29  ;;  %4106 = vpow2.f32 %v2370_v38  ;;  %v2376_v49 = vmul.f32 1.442695, %v2281_v41  ;;  %v2123_v50 = vpop.f32.mrf.mxu1 }
 0x409   : > { %v4083_v51 = vpop.eup %4082  ;;  %4108 = vrcp.f32 %v2462_v45  ;;  %v2465_v52 = vadd.f32 1.0, %v4081_v10  ;;  %v2372_v54 = vmul.f32 1.442695, %v2279_v46  ;;  %v2284_v55 = vsub.f32 0.0, %v2132_v47 }
 0x40a   : > { %v4085_v56 = vpop.eup %4084  ;;  %3383 = vst [vmem:[%s5012_s27 + $0x38] sm:$0xff] %v3255_v48   ;;  %v3250_v57 = vpack.c.bf16 %v4083_v51, %v4075_v36  ;;  %4110 = vpow2.f32 %v2376_v49  ;;  %v2124_v58 = vadd.f32 %v4988_v43, %v2123_v50  ;;  %v3859_v59 = vpop.f32.mrf.mxu1 }
 0x40b   : > { %v4087_v60 = vpop.eup %4086  ;;  %4112 = vrcp.f32 %v2465_v52  ;;  %v2463_v61 = vadd.f32 1.0, %v4085_v56  ;;  %v2382_v62 = vmul.f32 1.442695, %v2284_v55  ;;  %v2135_v63 = vadd.f32 %v3859_v59, %v4988_v43 }
 0x40c   : > { %v4089_v0 = vpop.eup %4088  ;;  %3382 = vst [vmem:[%s5012_s27 + $0x30] sm:$0xff] %v3250_v57   ;;  %v2468_v1 = vadd.f32 1.0, %v4087_v60  ;;  %4114 = vpow2.f32 %v2372_v54  ;;  %v2282_v2 = vsub.f32 0.0, %v2124_v58  ;;  %v2126_v3 = vpop.f32.mrf.mxu1 }
 0x40d   : > { %v4091_v4 = vpop.eup %4090  ;;  %4116 = vrcp.f32 %v2463_v61  ;;  %v2285_v5 = vsub.f32 0.0, %v2135_v63  ;;  %v2127_v6 = vadd.f32 %v4988_v43, %v2126_v3 }
 0x40e   : > { %v4093_v7 = vpop.eup %4092  ;;  %4118 = vrcp.f32 %v2468_v1  ;;  %v2466_v8 = vadd.f32 1.0, %v4091_v4  ;;  %v2378_v9 = vmul.f32 1.442695, %v2282_v2  ;;  %v3862_v11 = vpop.f32.mrf.mxu1 }
 0x40f   : > { %v4095_v12 = vpop.eup %4094  ;;  %4120 = vpow2.f32 %v2382_v62  ;;  %v2384_v53 = vmul.f32 1.442695, %v2285_v5  ;;  %v2283_v13 = vsub.f32 0.0, %v2127_v6  ;;  %v2148_v14 = vadd.f32 %v3862_v11, %v4988_v43 }
 0x410   : > { %v4097_v15 = vpop.eup %4096  ;;  %4122 = vrcp.f32 %v2466_v8  ;;  %v2469_v16 = vadd.f32 1.0, %v4095_v12  ;;  %v2139_v17 = vpop.f32.mrf.mxu1 }
 0x411   : > { %v4099_v18 = vpop.eup %4098  ;;  %v3265_v19 = vpack.c.bf16 %v4097_v15, %v4089_v0  ;;  %4124 = vpow2.f32 %v2378_v9  ;;  %v2380_v20 = vmul.f32 1.442695, %v2283_v13  ;;  %v2288_v21 = vsub.f32 0.0, %v2148_v14 }
 0x412   : > { %v4101_v22 = vpop.eup %4100  ;;  %4126 = vrcp.f32 %v2469_v16  ;;  %v2467_v23 = vadd.f32 1.0, %v4099_v18  ;;  %v2140_v24 = vadd.f32 %v4988_v43, %v2139_v17  ;;  %v3863_v25 = vpop.f32.mrf.mxu1 }
 0x413   : > { %v4103_v26 = vpop.eup %4102  ;;  %3385 = vst [vmem:[%s5012_s27 + $0x48] sm:$0xff] %v3265_v19   ;;  %v3260_v27 = vpack.c.bf16 %v4101_v22, %v4093_v7  ;;  %4128 = vpow2.f32 %v2384_v53  ;;  %v2390_v28 = vmul.f32 1.442695, %v2288_v21  ;;  %v2151_v29 = vadd.f32 %v3863_v25, %v4988_v43 }
 0x414   : > { %v4105_v30 = vpop.eup %4104  ;;  %4130 = vrcp.f32 %v2467_v23  ;;  %v2472_v31 = vadd.f32 1.0, %v4103_v26  ;;  %v2286_v32 = vsub.f32 0.0, %v2140_v24  ;;  %v2142_v33 = vpop.f32.mrf.mxu1 }
 0x415   : > { %v4107_v34 = vpop.eup %4106  ;;  %3384 = vst [vmem:[%s5012_s27 + $0x40] sm:$0xff] %v3260_v27   ;;  %4132 = vpow2.f32 %v2380_v20  ;;  %v2289_v35 = vsub.f32 0.0, %v2151_v29  ;;  %v2143_v36 = vadd.f32 %v4988_v43, %v2142_v33 }
 0x416   : > { %v4109_v37 = vpop.eup %4108  ;;  %4134 = vrcp.f32 %v2472_v31  ;;  %v2470_v38 = vadd.f32 1.0, %v4107_v34  ;;  %v2386_v39 = vmul.f32 1.442695, %v2286_v32  ;;  %v3866_v40 = vpop.f32.mrf.mxu1 }
 0x417   : > { %v4111_v41 = vpop.eup %4110  ;;  %4136 = vpow2.f32 %v2390_v28  ;;  %v2392_v42 = vmul.f32 1.442695, %v2289_v35  ;;  %v2287_v44 = vsub.f32 0.0, %v2143_v36  ;;  %v2164_v45 = vadd.f32 %v3866_v40, %v4988_v43 }
 0x418   : > { %v4113_v46 = vpop.eup %4112  ;;  %4138 = vrcp.f32 %v2470_v38  ;;  %v2473_v47 = vadd.f32 1.0, %v4111_v41  ;;  %v2155_v10 = vpop.f32.mrf.mxu1 }
 0x419   : > { %v4115_v48 = vpop.eup %4114  ;;  %v3275_v49 = vpack.c.bf16 %v4113_v46, %v4105_v30  ;;  %4140 = vpow2.f32 %v2386_v39  ;;  %v2388_v50 = vmul.f32 1.442695, %v2287_v44  ;;  %v2292_v51 = vsub.f32 0.0, %v2164_v45 }
 0x41a   : > { %v4117_v52 = vpop.eup %4116  ;;  %4142 = vrcp.f32 %v2473_v47  ;;  %v2471_v54 = vadd.f32 1.0, %v4115_v48  ;;  %v2156_v55 = vadd.f32 %v4988_v43, %v2155_v10  ;;  %v3867_v56 = vpop.f32.mrf.mxu1 }
 0x41b   : > { %v4119_v57 = vpop.eup %4118  ;;  %3387 = vst [vmem:[%s5012_s27 + $0x58] sm:$0xff] %v3275_v49   ;;  %v3270_v58 = vpack.c.bf16 %v4117_v52, %v4109_v37  ;;  %4144 = vpow2.f32 %v2392_v42  ;;  %v2398_v59 = vmul.f32 1.442695, %v2292_v51  ;;  %v2167_v60 = vadd.f32 %v3867_v56, %v4988_v43 }
 0x41c   : > { %v4121_v61 = vpop.eup %4120  ;;  %4146 = vrcp.f32 %v2471_v54  ;;  %v2290_v62 = vsub.f32 0.0, %v2156_v55  ;;  %v2158_v63 = vpop.f32.mrf.mxu1 }
 0x41d   : > { %v4123_v0 = vpop.eup %4122  ;;  %3386 = vst [vmem:[%s5012_s27 + $0x50] sm:$0xff] %v3270_v58   ;;  %v2476_v1 = vadd.f32 1.0, %v4121_v61  ;;  %4148 = vpow2.f32 %v2388_v50  ;;  %v2293_v2 = vsub.f32 0.0, %v2167_v60  ;;  %v2159_v3 = vadd.f32 %v4988_v43, %v2158_v63 }
 0x41e   : > { %v4125_v4 = vpop.eup %4124  ;;  %4150 = vpow2.f32 %v2398_v59  ;;  %v2394_v5 = vmul.f32 1.442695, %v2290_v62  ;;  %v3870_v6 = vpop.f32.mrf.mxu1 }
 0x41f   : > { %v4127_v7 = vpop.eup %4126  ;;  %4152 = vrcp.f32 %v2476_v1  ;;  %v2474_v8 = vadd.f32 1.0, %v4125_v4  ;;  %v2400_v9 = vmul.f32 1.442695, %v2293_v2  ;;  %v2291_v11 = vsub.f32 0.0, %v2159_v3 }
 0x420   : > { %v4129_v12 = vpop.eup %4128  ;;  %v3285_v53 = vpack.c.bf16 %v4127_v7, %v4119_v57  ;;  %4154 = vpow2.f32 %v2394_v5  ;;  %v2180_v13 = vadd.f32 %v3870_v6, %v4988_v43  ;;  %v2171_v14 = vpop.f32.mrf.mxu1 }
 0x421   : > { %v4131_v15 = vpop.eup %4130  ;;  %4156 = vrcp.f32 %v2474_v8  ;;  %v2477_v16 = vadd.f32 1.0, %v4129_v12  ;;  %v2396_v17 = vmul.f32 1.442695, %v2291_v11  ;;  %v2172_v18 = vadd.f32 %v4988_v43, %v2171_v14 }
 0x422   : > { %v4133_v19 = vpop.eup %4132  ;;  %3389 = vst [vmem:[%s5012_s27 + $0x68] sm:$0xff] %v3285_v53   ;;  %v3280_v20 = vpack.c.bf16 %v4131_v15, %v4123_v0  ;;  %4158 = vpow2.f32 %v2400_v9  ;;  %v2296_v21 = vsub.f32 0.0, %v2180_v13  ;;  %v3871_v22 = vpop.f32.mrf.mxu1 }
 0x423   : > { %v4135_v23 = vpop.eup %4134  ;;  %4160 = vrcp.f32 %v2477_v16  ;;  %v2475_v24 = vadd.f32 1.0, %v4133_v19  ;;  %v2294_v25 = vsub.f32 0.0, %v2172_v18  ;;  %v2183_v26 = vadd.f32 %v3871_v22, %v4988_v43 }
 0x424   : > { %v4137_v27 = vpop.eup %4136  ;;  %3388 = vst [vmem:[%s5012_s27 + $0x60] sm:$0xff] %v3280_v20   ;;  %4162 = vpow2.f32 %v2396_v17  ;;  %v2406_v28 = vmul.f32 1.442695, %v2296_v21  ;;  %v2174_v29 = vpop.f32.mrf.mxu1 }
 0x425   : > { %v4139_v30 = vpop.eup %4138  ;;  %4164 = vrcp.f32 %v2475_v24  ;;  %v2480_v31 = vadd.f32 1.0, %v4137_v27  ;;  %v2402_v32 = vmul.f32 1.442695, %v2294_v25  ;;  %v2297_v33 = vsub.f32 0.0, %v2183_v26 }
 0x426   : > { %v4141_v34 = vpop.eup %4140  ;;  %4166 = vpow2.f32 %v2406_v28  ;;  %v2175_v35 = vadd.f32 %v4988_v43, %v2174_v29  ;;  %v3874_v36 = vpop.f32.mrf.mxu1 }
 0x427   : > { %v4143_v37 = vpop.eup %4142  ;;  %4168 = vrcp.f32 %v2480_v31  ;;  %v2478_v38 = vadd.f32 1.0, %v4141_v34  ;;  %v2408_v39 = vmul.f32 1.442695, %v2297_v33  ;;  %v2196_v40 = vadd.f32 %v3874_v36, %v4988_v43 }
 0x428   : > { %v4145_v41 = vpop.eup %4144  ;;  %v3295_v42 = vpack.c.bf16 %v4143_v37, %v4135_v23  ;;  %4170 = vpow2.f32 %v2402_v32  ;;  %v2295_v44 = vsub.f32 0.0, %v2175_v35  ;;  %v2187_v45 = vpop.f32.mrf.mxu1 }
 0x429   : > { %v4147_v46 = vpop.eup %4146  ;;  %4172 = vrcp.f32 %v2478_v38  ;;  %v2481_v47 = vadd.f32 1.0, %v4145_v41  ;;  %v2300_v10 = vsub.f32 0.0, %v2196_v40  ;;  %v2188_v48 = vadd.f32 %v4988_v43, %v2187_v45 }
 0x42a   : > { %v4149_v49 = vpop.eup %4148  ;;  %3391 = vst [vmem:[%s5012_s27 + $0x78] sm:$0xff] %v3295_v42   ;;  %v3290_v50 = vpack.c.bf16 %v4147_v46, %v4139_v30  ;;  %4174 = vpow2.f32 %v2408_v39  ;;  %v2404_v51 = vmul.f32 1.442695, %v2295_v44  ;;  %v3875_v52 = vpop.f32.mrf.mxu1 }
 0x42b   : > { %v4151_v54 = vpop.eup %4150  ;;  %4176 = vrcp.f32 %v2481_v47  ;;  %v2479_v55 = vadd.f32 1.0, %v4149_v49  ;;  %v2414_v56 = vmul.f32 1.442695, %v2300_v10  ;;  %v2298_v57 = vsub.f32 0.0, %v2188_v48 }
 0x42c   : > { %v4153_v58 = vpop.eup %4152  ;;  %3390 = vst [vmem:[%s5012_s27 + $0x70] sm:$0xff] %v3290_v50   ;;  %v2484_v59 = vadd.f32 1.0, %v4151_v54  ;;  %4178 = vpow2.f32 %v2404_v51  ;;  %v2199_v60 = vadd.f32 %v3875_v52, %v4988_v43  ;;  %v2190_v61 = vpop.f32.mrf.mxu1  ;;  %v4262_v54 = vld [vmem:[%s5156_s8] ss:$0 sm:$0xff] }
 0x42d   : > { %v4155_v62 = vpop.eup %4154  ;;  %4180 = vrcp.f32 %v2479_v55  ;;  %v2410_v63 = vmul.f32 1.442695, %v2298_v57  ;;  %v2191_v0 = vadd.f32 %v4988_v43, %v2190_v61 }
 0x42e   : > { %v4157_v1 = vpop.eup %4156  ;;  %4182 = vrcp.f32 %v2484_v59  ;;  %v2482_v2 = vadd.f32 1.0, %v4155_v62  ;;  %v2301_v3 = vsub.f32 0.0, %v2199_v60  ;;  %v3878_v4 = vpop.f32.mrf.mxu1 }
 0x42f   : > { %v4159_v5 = vpop.eup %4158  ;;  %4184 = vpow2.f32 %v2414_v56  ;;  %v2299_v6 = vsub.f32 0.0, %v2191_v0  ;;  %v2212_v7 = vadd.f32 %v3878_v4, %v4988_v43 }
 0x430   : > { %v4161_v8 = vpop.eup %4160  ;;  %4186 = vrcp.f32 %v2482_v2  ;;  %v2485_v9 = vadd.f32 1.0, %v4159_v5  ;;  %v2416_v11 = vmul.f32 1.442695, %v2301_v3  ;;  %v2203_v12 = vpop.f32.mrf.mxu1 }
 0x431   : > { %v4163_v53 = vpop.eup %4162  ;;  %v3305_v13 = vpack.c.bf16 %v4161_v8, %v4153_v58  ;;  %4188 = vpow2.f32 %v2410_v63  ;;  %v2412_v14 = vmul.f32 1.442695, %v2299_v6  ;;  %v2304_v15 = vsub.f32 0.0, %v2212_v7 }
 0x432   : > { %v4165_v16 = vpop.eup %4164  ;;  %4190 = vrcp.f32 %v2485_v9  ;;  %v2483_v17 = vadd.f32 1.0, %v4163_v53  ;;  %v2204_v18 = vadd.f32 %v4988_v43, %v2203_v12  ;;  %v3879_v19 = vpop.f32.mrf.mxu1 }
 0x433   : > { %v4167_v20 = vpop.eup %4166  ;;  %3393 = vst [vmem:[%s5012_s27 + $0x88] sm:$0xff] %v3305_v13   ;;  %v3300_v21 = vpack.c.bf16 %v4165_v16, %v4157_v1  ;;  %4192 = vpow2.f32 %v2416_v11  ;;  %v2422_v22 = vmul.f32 1.442695, %v2304_v15  ;;  %v2215_v23 = vadd.f32 %v3879_v19, %v4988_v43 }
 0x434   : > { %v4169_v24 = vpop.eup %4168  ;;  %4194 = vrcp.f32 %v2483_v17  ;;  %v2488_v25 = vadd.f32 1.0, %v4167_v20  ;;  %v2302_v26 = vsub.f32 0.0, %v2204_v18  ;;  %v2206_v27 = vpop.f32.mrf.mxu1 }
 0x435   : > { %v4171_v28 = vpop.eup %4170  ;;  %3392 = vst [vmem:[%s5012_s27 + $0x80] sm:$0xff] %v3300_v21   ;;  %4196 = vpow2.f32 %v2412_v14  ;;  %v2305_v29 = vsub.f32 0.0, %v2215_v23  ;;  %v2207_v30 = vadd.f32 %v4988_v43, %v2206_v27 }
 0x436   : > { %v4173_v31 = vpop.eup %4172  ;;  %4198 = vrcp.f32 %v2488_v25  ;;  %v2486_v32 = vadd.f32 1.0, %v4171_v28  ;;  %v2418_v33 = vmul.f32 1.442695, %v2302_v26  ;;  %v3882_v34 = vpop.f32.mrf.mxu1 }
 0x437   : > { %v4175_v35 = vpop.eup %4174  ;;  %4200 = vpow2.f32 %v2422_v22  ;;  %v2424_v36 = vmul.f32 1.442695, %v2305_v29  ;;  %v2303_v37 = vsub.f32 0.0, %v2207_v30  ;;  %v2228_v38 = vadd.f32 %v3882_v34, %v4988_v43 }
 0x438   : > { %v4177_v39 = vpop.eup %4176  ;;  %4202 = vrcp.f32 %v2486_v32  ;;  %v2489_v40 = vadd.f32 1.0, %v4175_v35  ;;  %v2219_v41 = vpop.f32.mrf.mxu1 }
 0x439   : > { %v4179_v42 = vpop.eup %4178  ;;  %v3315_v44 = vpack.c.bf16 %v4177_v39, %v4169_v24  ;;  %4204 = vpow2.f32 %v2418_v33  ;;  %v2420_v45 = vmul.f32 1.442695, %v2303_v37  ;;  %v2308_v46 = vsub.f32 0.0, %v2228_v38 }
 0x43a   : > { %v4181_v47 = vpop.eup %4180  ;;  %4206 = vrcp.f32 %v2489_v40  ;;  %v2487_v10 = vadd.f32 1.0, %v4179_v42  ;;  %v2220_v48 = vadd.f32 %v4988_v43, %v2219_v41  ;;  %v3883_v49 = vpop.f32.mrf.mxu1 }
 0x43b   : > { %v4183_v50 = vpop.eup %4182  ;;  %3395 = vst [vmem:[%s5012_s27 + $0x98] sm:$0xff] %v3315_v44   ;;  %v3310_v51 = vpack.c.bf16 %v4181_v47, %v4173_v31  ;;  %4208 = vpow2.f32 %v2424_v36  ;;  %v2430_v52 = vmul.f32 1.442695, %v2308_v46  ;;  %v2231_v55 = vadd.f32 %v4262_v54, %v3883_v49 }
 0x43c   : > { %v4185_v56 = vpop.eup %4184  ;;  %4210 = vrcp.f32 %v2487_v10  ;;  %v2306_v57 = vsub.f32 0.0, %v2220_v48  ;;  %v2222_v58 = vpop.f32.mrf.mxu1 }
 0x43d   : > { %v4187_v59 = vpop.eup %4186  ;;  %3394 = vst [vmem:[%s5012_s27 + $0x90] sm:$0xff] %v3310_v51   ;;  %v2492_v60 = vadd.f32 1.0, %v4185_v56  ;;  %4212 = vpow2.f32 %v2420_v45  ;;  %v2309_v43 = vsub.f32 0.0, %v2231_v55  ;;  %v2223_v61 = vadd.f32 %v4262_v54, %v2222_v58 }
 0x43e   : > { %v4189_v62 = vpop.eup %4188  ;;  %4214 = vpow2.f32 %v2430_v52  ;;  %v2426_v63 = vmul.f32 1.442695, %v2306_v57  ;;  %v3886_v0 = vpop.f32.mrf.mxu1 }
 0x43f   : > { %v4191_v1 = vpop.eup %4190  ;;  %4216 = vrcp.f32 %v2492_v60  ;;  %v2490_v2 = vadd.f32 1.0, %v4189_v62  ;;  %v2432_v3 = vmul.f32 1.442695, %v2309_v43  ;;  %v2307_v4 = vsub.f32 0.0, %v2223_v61 }
 0x440   : > { %v4193_v5 = vpop.eup %4192  ;;  %v3325_v6 = vpack.c.bf16 %v4191_v1, %v4183_v50  ;;  %4218 = vpow2.f32 %v2426_v63  ;;  %v2244_v7 = vadd.f32 %v4262_v54, %v3886_v0  ;;  %v2235_v8 = vpop.f32.mrf.mxu1 }
 0x441   : > { %v4195_v9 = vpop.eup %4194  ;;  %4220 = vrcp.f32 %v2490_v2  ;;  %v2493_v11 = vadd.f32 1.0, %v4193_v5  ;;  %v2428_v12 = vmul.f32 1.442695, %v2307_v4  ;;  %v2236_v53 = vadd.f32 %v4262_v54, %v2235_v8 }
 0x442   : > { %v4197_v13 = vpop.eup %4196  ;;  %3397 = vst [vmem:[%s5012_s27 + $0xa8] sm:$0xff] %v3325_v6   ;;  %v3320_v14 = vpack.c.bf16 %v4195_v9, %v4187_v59  ;;  %4222 = vpow2.f32 %v2432_v3  ;;  %v2312_v15 = vsub.f32 0.0, %v2244_v7  ;;  %v3887_v16 = vpop.f32.mrf.mxu1 }
 0x443   : > { %v4199_v17 = vpop.eup %4198  ;;  %4224 = vrcp.f32 %v2493_v11  ;;  %v2491_v18 = vadd.f32 1.0, %v4197_v13  ;;  %v2310_v19 = vsub.f32 0.0, %v2236_v53  ;;  %v2247_v20 = vadd.f32 %v4262_v54, %v3887_v16 }
 0x444   : > { %v4201_v21 = vpop.eup %4200  ;;  %3396 = vst [vmem:[%s5012_s27 + $0xa0] sm:$0xff] %v3320_v14   ;;  %4226 = vpow2.f32 %v2428_v12  ;;  %v2438_v22 = vmul.f32 1.442695, %v2312_v15  ;;  %v2238_v23 = vpop.f32.mrf.mxu1 }
 0x445   : > { %v4203_v24 = vpop.eup %4202  ;;  %4228 = vrcp.f32 %v2491_v18  ;;  %v2496_v25 = vadd.f32 1.0, %v4201_v21  ;;  %v2434_v26 = vmul.f32 1.442695, %v2310_v19  ;;  %v2313_v27 = vsub.f32 0.0, %v2247_v20 }
 0x446   : > { %v4205_v28 = vpop.eup %4204  ;;  %4230 = vpow2.f32 %v2438_v22  ;;  %v2239_v29 = vadd.f32 %v4262_v54, %v2238_v23 }
 0x447   : > { %v4207_v30 = vpop.eup %4206  ;;  %4232 = vrcp.f32 %v2496_v25  ;;  %v2494_v31 = vadd.f32 1.0, %v4205_v28  ;;  %v2440_v32 = vmul.f32 1.442695, %v2313_v27 }
 0x448   : > { %v4209_v33 = vpop.eup %4208  ;;  %v3335_v34 = vpack.c.bf16 %v4207_v30, %v4199_v17  ;;  %4234 = vpow2.f32 %v2434_v26  ;;  %v2311_v35 = vsub.f32 0.0, %v2239_v29 }
 0x449   : > { %v4211_v36 = vpop.eup %4210  ;;  %4236 = vrcp.f32 %v2494_v31  ;;  %v2497_v37 = vadd.f32 1.0, %v4209_v33 }
 0x44a   : > { %v4213_v38 = vpop.eup %4212  ;;  %3399 = vst [vmem:[%s5012_s27 + $0xb8] sm:$0xff] %v3335_v34   ;;  %v3330_v39 = vpack.c.bf16 %v4211_v36, %v4203_v24  ;;  %4238 = vpow2.f32 %v2440_v32  ;;  %v2436_v40 = vmul.f32 1.442695, %v2311_v35 }
 0x44b   : > { %v4215_v41 = vpop.eup %4214  ;;  %4240 = vrcp.f32 %v2497_v37  ;;  %v2495_v42 = vadd.f32 1.0, %v4213_v38 }
 0x44c   : > { %v4217_v44 = vpop.eup %4216  ;;  %3398 = vst [vmem:[%s5012_s27 + $0xb0] sm:$0xff] %v3330_v39   ;;  %4242 = vpow2.f32 %v2436_v40  ;;  %v2500_v46 = vadd.f32 1.0, %v4215_v41 }
 0x44d   : > { %v4219_v45 = vpop.eup %4218  ;;  %4244 = vrcp.f32 %v2495_v42 }
 0x44e   : > { %v4221_v47 = vpop.eup %4220  ;;  %v2498_v48 = vadd.f32 1.0, %v4219_v45  ;;  %4246 = vrcp.f32 %v2500_v46 }
 0x44f   : > { %v4223_v10 = vpop.eup %4222 }
 0x450   : > { %v4225_v49 = vpop.eup %4224  ;;  %v2501_v50 = vadd.f32 1.0, %v4223_v10 }
 0x451   : > { %v4227_v51 = vpop.eup %4226  ;;  %v3345_v52 = vpack.c.bf16 %v4225_v49, %v4217_v44 }
 0x452   : > { %v4229_v54 = vpop.eup %4228  ;;  %4248 = vrcp.f32 %v2501_v50  ;;  %v2499_v55 = vadd.f32 1.0, %v4227_v51 }
 0x453   : > { %v4231_v56 = vpop.eup %4230  ;;  %3401 = vst [vmem:[%s5012_s27 + $0xc8] sm:$0xff] %v3345_v52   ;;  %v3340_v57 = vpack.c.bf16 %v4229_v54, %v4221_v47  ;;  %4250 = vrcp.f32 %v2498_v48 }
 0x454   : > { %v4233_v58 = vpop.eup %4232  ;;  %4252 = vrcp.f32 %v2499_v55  ;;  %v2504_v60 = vadd.f32 1.0, %v4231_v56 }
 0x455   : > { %v4235_v59 = vpop.eup %4234  ;;  %3400 = vst [vmem:[%s5012_s27 + $0xc0] sm:$0xff] %v3340_v57  }
 0x456   : > { %v4237_v43 = vpop.eup %4236  ;;  %v2502_v62 = vadd.f32 1.0, %v4235_v59  ;;  %4254 = vrcp.f32 %v2504_v60 }
 0x457   : > { %v4239_v61 = vpop.eup %4238 }
 0x458   : > { %v4241_v63 = vpop.eup %4240  ;;  %v2505_v0 = vadd.f32 1.0, %v4239_v61 }
 0x459   : > { %v4243_v1 = vpop.eup %4242  ;;  %v3355_v2 = vpack.c.bf16 %v4241_v63, %v4233_v58 }
 0x45a   : > { %v4245_v3 = vpop.eup %4244  ;;  %4256 = vrcp.f32 %v2505_v0  ;;  %v2503_v4 = vadd.f32 1.0, %v4243_v1 }
 0x45b   : > { %3403 = vst [vmem:[%s5012_s27 + $0xd8] sm:$0xff] %v3355_v2   ;;  %v3350_v5 = vpack.c.bf16 %v4245_v3, %v4237_v43  ;;  %4258 = vrcp.f32 %v2502_v62  ;;  %v4247_v6 = vpop.eup %4246 }
 0x45c   : > { %4260 = vrcp.f32 %v2503_v4 }
 0x45d   : > { %3402 = vst [vmem:[%s5012_s27 + $0xd0] sm:$0xff] %v3350_v5  }
 0x45f   : > { %v4249_v7 = vpop.eup %4248 }
 0x460   : > { %v4251_v8 = vpop.eup %4250  ;;  %v3365_v9 = vpack.c.bf16 %v4249_v7, %v4247_v6 }
 0x461   : > { %v4253_v11 = vpop.eup %4252 }
 0x462   : > { %3405 = vst [vmem:[%s5012_s27 + $0xe8] sm:$0xff] %v3365_v9   ;;  %v3360_v12 = vpack.c.bf16 %v4253_v11, %v4251_v8 }
 0x463   : > { %v4255_v53 = vpop.eup %4254 }
 0x464   : > { %3404 = vst [vmem:[%s5012_s27 + $0xe0] sm:$0xff] %v3360_v12  }
 0x467   : > { %v4257_v13 = vpop.eup %4256 }
 0x468   : > { %v4259_v14 = vpop.eup %4258  ;;  %v3375_v15 = vpack.c.bf16 %v4257_v13, %v4255_v53  ;;  %2897 = sbr.rel (!%p5178_p6) target bundleno = 1160 (0x488), region = 80 }
 0x469   : > { %v4261_v16 = vpop.eup %4260 }
 0x46a   : > { %3407 = vst [vmem:[%s5012_s27 + $0xf8] sm:$0xff] %v3375_v15   ;;  %v3370_v17 = vpack.c.bf16 %v4261_v16, %v4259_v14 }
 0x46c   : > { %3406 = vst [vmem:[%s5012_s27 + $0xf0] sm:$0xff] %v3370_v17  }
 0x46d   : > { %s5189_s1 = smov (!%p2900_p3, %s2899_s1), 64 }
 0x46e   : > { %s5090_s20 = sshll.u32 %s5189_s1, 6 }
 0x46f   : > { %s2904_s23 = ssub.s32 4096, %s5090_s20 }
 0x470   : > { %2905 = vsyncadd %s2891_s26, %s2904_s23  ;;  %p3145_p12 = scmp.ne.s32.totalorder %s5090_s20, 0  ;;  %s3216_s21 = sshll.u32 %s4550_s13, 12 }
 0x471   : > { %s5100_s15 = scalar_lea.hbm %s5157_s9, %s3216_s21  ;;  %s2910_s29 = sshll.u32 %s5012_s27, 4  ;;  %s5103_s29 = int_to_ptr.vmem [resolvable:$true] %s2910_s29 }
 0x472   : > { %s4393_s16 = scalar_lea.vmem %s5103_s29, %s5090_s20  ;;  %s4476_s19 = smov [#allocation11]  }
 0x473   : > { %p4394_p9 = scmp.ne.s32.totalorder %s5103_s29, %s4393_s16  ;;  %s4397_s28 = sshll.u32 %s4476_s19, 4  ;;  %s4398_s28 = int_to_ptr.vmem [resolvable:$false] %s4397_s28 }
 0x474   : > { %s4399_s13 = scalar_lea.vmem %s4398_s28, 8192  ;;  %p4400_p4 = scmp.lt.s32.totalorder %s5103_s29, %s4398_s28 }
 0x475   : > { %p4395_p8 = pnand %p4394_p9, %p3145_p12  ;;  %p4401_p2 = scmp.lt.s32.totalorder %s4399_s13, %s4393_s16 }
 0x477   : > { %p4396_p10 = pneg %p4395_p8  ;;  %p4402_p0 = por %p4401_p2, %p4400_p4 }
 0x479   : > { %p4403_p7 = pnand %p4402_p0, %p4396_p10 }
 0x47b   : > { %4406 = shalt.err (!%p4403_p7)
}
 0x47c   : > { %s4407_s27 = scalar_lea.hbm %s5100_s15, %s5090_s20  ;;  %s4411_s24 = scalar_lea.hbm %s5157_s9, 8000 }
 0x47d   : > { %p4408_p11 = scmp.ne.s32.totalorder %s5100_s15, %s4407_s27  ;;  %p4412_p5 = scmp.lt.s32.totalorder %s5100_s15, %s5157_s9 }
 0x47e   : > { %p4413_p6 = scmp.lt.s32.totalorder %s4411_s24, %s4407_s27 }
 0x47f   : > { %p4409_p13 = pnand %p4408_p11, %p3145_p12 }
 0x480   : > { %p4414_p3 = por %p4413_p6, %p4412_p5 }
 0x481   : > { %p4410_p1 = pneg %p4409_p13 }
 0x483   : > { %p4415_p9 = pnand %p4414_p3, %p4410_p1 }
 0x485   : > { %4418 = shalt.err (!%p4415_p9)
}
 0x486   : > { %s4477_s21 = smov 64   ;;  %s4478_s18 = smov 4  }
 0x487   : > { %2916 = dma.vmem_to_hbm [thread:$0]  (%p3145_p12), %s5103_s29, %s5090_s20, %s5100_s15, %s2891_s26, %s4477_s21, %s4477_s21, %s4478_s18  }
 0x488 PF: > { %s2925_s14 = sand.u32 1, %s4453_s30   ;;  %p5179_p8 = scmp.ne.s32.totalorder %s5169_s22, 0 }
 0x489   : > { %p5180_p10 = scmp.ge.s32.totalorder %s4465_s12, 2  ;;  %s2926_s16 = scalar_lea.sflag [#allocation4], %s2925_s14 }
 0x48b   : > { %p3920_p4 = pnand %p5180_p10, %p5179_p8 }
 0x48d   : > { %p3921_p2 = pneg %p3920_p4 }
 0x48f   : > { %4448 = dma.done.wait (%p3921_p2), %s2926_s16, 4096  }
 0x490   : > { %4450 = vsyncadd (%p3921_p2), %s2926_s16, 4294963200  ;;  %s5181_s12 = sld [smem:[#allocation16_spill]]  ;;  %s5183_s30 = smov %s4457_s10 }
 0x491   : > { %s5182_s19 = sld [smem:[#allocation17_spill]]  ;;  %s5184_s10 = smov %s4461_s11 }
 0x496   : > { %p24_p0 = scmp.ge.s32.totalorder %s5181_s12, 4  }
 0x497   : > { %s5185_s11 = smov %s5182_s19 }
 0x498   :  { %26 = sbr.rel (!%p24_p0) target bundleno = 10 (0xa), region = 117 }
 0x49d   :  { %2931 = vsyncpa [#allocation3], 1 }
 0x49e   :  { %2933 = vsyncpa [#allocation3 + $0x1], 1 }
 0x49f   :  { %2934 = vsyncpa [#allocation6], 1 }
 0x4a0   :  { %2935 = vsyncpa [#allocation9], 1 }
 0x4a1   :  { %2936 = vsyncpa [#allocation4], 1 }
 0x4a2   :  { %2938 = vsyncpa [#allocation4 + $0x1], 1 }

</bundles_post_ra>
